<compile_context>
chip_gen: v5e
topology: v5e:2x2
jax: 0.10.0
libtpu: 0.0.40
codegen_flags: <defaults>
</compile_context>

<pallas_src>
import jax
import jax.numpy as jnp
from jax import lax
from jax.experimental import pallas as pl
from jax.experimental.pallas import tpu as pltpu

# ----- configuration (mirrors `data` / `opt` of the PyTorch module) -----
BATCH = 2
SENT_LEN = 8
WORD_LEN = 5
WORD_VOCAB = 50
CHAR_VOCAB = 30
WORD_EMB_DIM = 24          # data.word_emb_dim
CHAR_EMB_DIM = 8
CHAR_HIDDEN_DIM = 8        # opt.char_hidden_dim
HIDDEN_DIM = 32            # opt.hidden_dim
LSTM_HIDDEN = HIDDEN_DIM // 2                   # per-direction hidden = 16
INPUT_SIZE = WORD_EMB_DIM + CHAR_HIDDEN_DIM     # 32
NUM_LABELS = 10            # data.label_alphabet.size()
NUM_TAGS = NUM_LABELS + 2  # label_alphabet.size() + 2
TAGS_PAD = 128             # lane-dense output slab width (sliced back to NUM_TAGS in wrapper)


def bilstm_tag_kernel(xg_ref, len_ref, wih_ref, ball_ref, whh_ref, w2_ref, b2_ref,
                      out_ref, hout_scr):
    """Fused bidirectional LSTM + hidden2tag.

    xg_ref  : (T*B, 2*D_in) f32  row block t holds [x[t] | x[T-1-t]] per batch row
    len_ref : (B, 1) int32       sequence lengths (0 for batch-padding rows)
    wih_ref : (2*D_in, 8H)       gate-interleaved block-diagonal input weights
    ball_ref: (1, 8H)            folded b_ih + b_hh, gate-interleaved
    whh_ref : (2H, 8H)           gate-interleaved block-diagonal recurrent weights
    w2_ref  : (2H, TAGS_PAD)     hidden2tag weights (zero-padded lanes)
    b2_ref  : (1, TAGS_PAD)
    out_ref : (T*B, TAGS_PAD)
    hout_scr: (T*B, 2H)          masked hidden states, [fwd | bwd] per time step

    Gate column layout (each block H wide): [i_f, i_b, f_f, f_b, g_f, g_b, o_f, o_b],
    so gates[:, k*2H:(k+1)*2H] is gate k for the combined [fwd | bwd] state.
    """
    TB = xg_ref.shape[0]
    B = len_ref.shape[0]
    T = TB // B
    H2 = whh_ref.shape[0]      # 2 * per-direction hidden
    H = H2 // 2

    # ---- hoisted: input projection for both directions, one lane-dense MXU GEMM ----
    xg = (jnp.dot(xg_ref[...], wih_ref[...], preferred_element_type=jnp.float32)
          + ball_ref[...])                                              # (T*B, 8H)
    whh = whh_ref[...]                                                  # (2H, 8H)

    # ---- hoisted mask helpers (per-sublane lengths, fwd/bwd column split) ----
    lengths = jnp.broadcast_to(len_ref[...], (B, H2))                   # (B, 2H) int32
    is_fwd = lax.broadcasted_iota(jnp.int32, (B, H2), 1) < H            # (B, 2H) bool

    # h/c carried in vregs across the fully-unrolled loop (no VMEM round-trip)
    h = jnp.zeros((B, H2), jnp.float32)
    c = jnp.zeros((B, H2), jnp.float32)

    # ---- fused fwd+bwd recurrence, fully unrolled (T static) ----
    for t in range(T):
        tb = T - 1 - t
        gates = (xg[t * B:(t + 1) * B, :]
                 + jnp.dot(h, whh, preferred_element_type=jnp.float32))  # (B, 8H)
        i_g = jax.nn.sigmoid(gates[:, 0 * H2:1 * H2])
        f_g = jax.nn.sigmoid(gates[:, 1 * H2:2 * H2])
        g_g = jnp.tanh(gates[:, 2 * H2:3 * H2])
        o_g = jax.nn.sigmoid(gates[:, 3 * H2:4 * H2])
        c_new = f_g * c + i_g * g_g
        h_new = o_g * jnp.tanh(c_new)
        # packed-sequence semantics: fwd half valid while t < len, bwd half while tb < len
        step = jnp.where(is_fwd, jnp.int32(t), jnp.int32(tb))
        valid = step < lengths
        h = jnp.where(valid, h_new, h)
        c = jnp.where(valid, c_new, c)
        h_out = jnp.where(valid, h_new, 0.0)        # pad_packed_sequence zero-pads
        # store fwd half at time t, bwd half at time tb (off the dependency chain)
        hout_scr[t * B:(t + 1) * B, 0:H] = h_out[:, 0:H]
        hout_scr[tb * B:(tb + 1) * B, H:H2] = h_out[:, H:H2]

    # ---- dropout (identity in eval) + hidden2tag, lane-dense full-width store ----
    out_ref[...] = (jnp.dot(hout_scr[...], w2_ref[...], preferred_element_type=jnp.float32)
                    + b2_ref[...])


def _build_fused_weights(params):
    """Gate-interleaved block-diagonal weights for the fused bidirectional recurrence."""
    D, H = INPUT_SIZE, LSTM_HIDDEN
    wih_blk = jnp.zeros((2 * D, 8 * H), jnp.float32)
    whh_blk = jnp.zeros((2 * H, 8 * H), jnp.float32)
    b_all = jnp.zeros((1, 8 * H), jnp.float32)
    for g in range(4):  # PyTorch gate order: i, f, g, o
        fcol = slice(2 * g * H, (2 * g + 1) * H)        # fwd gate g columns
        bcol = slice((2 * g + 1) * H, (2 * g + 2) * H)  # bwd gate g columns
        gsrc = slice(g * H, (g + 1) * H)
        wih_blk = wih_blk.at[:D, fcol].set(params["wih_f"][:, gsrc])
        wih_blk = wih_blk.at[D:, bcol].set(params["wih_b"][:, gsrc])
        whh_blk = whh_blk.at[:H, fcol].set(params["whh_f"][:, gsrc])
        whh_blk = whh_blk.at[H:, bcol].set(params["whh_b"][:, gsrc])
        b_all = b_all.at[:, fcol].set(params["b_f"][:, gsrc])
        b_all = b_all.at[:, bcol].set(params["b_b"][:, gsrc])
    return wih_blk, whh_blk, b_all


def init_params(key):
    ks = jax.random.split(key, 12)
    k_lstm = float(1.0 / (LSTM_HIDDEN ** 0.5))
    k_lin = float(1.0 / (HIDDEN_DIM ** 0.5))

    def u(kk, shp, s):
        return jax.random.uniform(kk, shp, jnp.float32, -s, s)

    return {
        "word_emb": jax.random.normal(ks[0], (WORD_VOCAB, WORD_EMB_DIM), jnp.float32) * 0.1,
        "char_emb": jax.random.normal(ks[1], (CHAR_VOCAB, CHAR_EMB_DIM), jnp.float32) * 0.1,
        "char_proj_w": u(ks[2], (CHAR_EMB_DIM, CHAR_HIDDEN_DIM), 0.3),
        "char_proj_b": u(ks[3], (CHAR_HIDDEN_DIM,), 0.3),
        # LSTM weights, PyTorch layout W_ih:(4H, D) -> stored transposed (D, 4H);
        # b = b_ih + b_hh folded into one (1, 4H) bias.
        "wih_f": u(ks[4], (INPUT_SIZE, 4 * LSTM_HIDDEN), k_lstm),
        "whh_f": u(ks[5], (LSTM_HIDDEN, 4 * LSTM_HIDDEN), k_lstm),
        "b_f":   u(ks[6], (1, 4 * LSTM_HIDDEN), k_lstm),
        "wih_b": u(ks[7], (INPUT_SIZE, 4 * LSTM_HIDDEN), k_lstm),
        "whh_b": u(ks[8], (LSTM_HIDDEN, 4 * LSTM_HIDDEN), k_lstm),
        "b_b":   u(ks[9], (1, 4 * LSTM_HIDDEN), k_lstm),
        # hidden2tag
        "w2":    u(ks[10], (HIDDEN_DIM, NUM_TAGS), k_lin),
        "b2":    u(ks[11], (1, NUM_TAGS), k_lin),
    }


@jax.jit
def word_sequence_forward(params, word_inputs, word_seq_lengths,
                          char_inputs, char_seq_lengths, char_seq_recover):
    B, T = word_inputs.shape

    # ---------------- WordRep (glue, plain JAX) ----------------
    # TODO(synk): the original WordRep module (char LSTM/CNN) is not provided in the
    # reference code; a char-embedding masked mean-pool + linear projection stands in.
    word_emb = jnp.take(params["word_emb"], word_inputs, axis=0)            # (B, T, WORD_EMB_DIM)
    char_emb = jnp.take(params["char_emb"], char_inputs, axis=0)            # (B*T, WORD_LEN, CHAR_EMB)
    word_len = char_inputs.shape[1]
    len_f = jnp.maximum(char_seq_lengths, 1).astype(jnp.float32)[:, None]
    pos = jnp.arange(word_len)[None, :, None]
    cmask = (pos < char_seq_lengths[:, None, None]).astype(jnp.float32)
    char_pooled = (char_emb * cmask).sum(axis=1) / len_f                    # (B*T, CHAR_EMB_DIM)
    char_feat = char_pooled @ params["char_proj_w"] + params["char_proj_b"]
    char_feat = jnp.take(char_feat, char_seq_recover, axis=0).reshape(B, T, CHAR_HIDDEN_DIM)
    word_represent = jnp.concatenate([word_emb, char_feat], axis=-1)        # (B, T, INPUT_SIZE)

    # ---------------- kernel-side layout prep ----------------
    B_pad = ((B + 7) // 8) * 8                                              # sublane-aligned batch
    x_tm = jnp.transpose(word_represent, (1, 0, 2)).astype(jnp.float32)     # (T, B, D_in)
    x_tm = jnp.pad(x_tm, ((0, 0), (0, B_pad - B), (0, 0)))
    # pair fwd time t with bwd time T-1-t so the fused loop reads one contiguous row block
    x_pair = jnp.concatenate([x_tm, x_tm[::-1]], axis=-1)                   # (T, B_pad, 2*D_in)
    xg_in = x_pair.reshape(T * B_pad, 2 * INPUT_SIZE)

    lengths = jnp.pad(word_seq_lengths.astype(jnp.int32), (0, B_pad - B)).reshape(B_pad, 1)

    wih_blk, whh_blk, b_all = _build_fused_weights(params)
    w2_pad = jnp.zeros((HIDDEN_DIM, TAGS_PAD), jnp.float32).at[:, :NUM_TAGS].set(params["w2"])
    b2_pad = jnp.zeros((1, TAGS_PAD), jnp.float32).at[:, :NUM_TAGS].set(params["b2"])

    # TODO(synk): for large B/T, add a "parallel" grid axis over batch tiles (v7x 2nd TC)
    # and tile T with an "arbitrary" axis instead of keeping the whole sequence resident.
    vmem = pl.BlockSpec(memory_space=pltpu.MemorySpace.VMEM)
    out_flat = pl.pallas_call(
        bilstm_tag_kernel,
        out_shape=jax.ShapeDtypeStruct((T * B_pad, TAGS_PAD), jnp.float32),
        in_specs=[vmem] * 7,
        out_specs=vmem,
        scratch_shapes=[pltpu.VMEM((T * B_pad, HIDDEN_DIM), jnp.float32)],  # (T*B, 2H) hidden out
    )(xg_in, lengths, wih_blk, b_all, whh_blk, w2_pad, b2_pad)

    out = out_flat.reshape(T, B_pad, TAGS_PAD)[:, :B, :NUM_TAGS]            # (T, B, NUM_TAGS)
    return jnp.transpose(out, (1, 0, 2))                                    # (B, T, NUM_TAGS)


if __name__ == "__main__":
    key = jax.random.PRNGKey(0)
    pkey, ikey = jax.random.split(key)
    params = init_params(pkey)

    k1, k2, k3 = jax.random.split(ikey, 3)
    word_inputs = jax.random.randint(k1, (BATCH, SENT_LEN), 1, WORD_VOCAB, dtype=jnp.int32)
    # pack_padded_sequence requires descending lengths; max length == SENT_LEN
    word_seq_lengths = jnp.array([SENT_LEN, SENT_LEN - 2], dtype=jnp.int32)
    char_inputs = jax.random.randint(k2, (BATCH * SENT_LEN, WORD_LEN), 1, CHAR_VOCAB, dtype=jnp.int32)
    char_seq_lengths = jax.random.randint(k3, (BATCH * SENT_LEN,), 1, WORD_LEN + 1, dtype=jnp.int32)
    char_seq_recover = jnp.arange(BATCH * SENT_LEN, dtype=jnp.int32)

    out = word_sequence_forward(params, word_inputs, word_seq_lengths,
                                char_inputs, char_seq_lengths, char_seq_recover)
    out = jax.block_until_ready(out)
    assert out.shape == (BATCH, SENT_LEN, NUM_TAGS)
    assert out.dtype == jnp.float32
    print("KERNEL_OK")
</pallas_src>

<mosaic_0001>
module attributes {stable_mosaic.version = 11 : i64} {
  func.func @bilstm_tag_kernel(%arg0: memref<64x64xf32, #tpu.memory_space<vmem>>, %arg1: memref<8x1xi32, #tpu.memory_space<vmem>>, %arg2: memref<64x128xf32, #tpu.memory_space<vmem>>, %arg3: memref<1x128xf32, #tpu.memory_space<vmem>>, %arg4: memref<32x128xf32, #tpu.memory_space<vmem>>, %arg5: memref<32x128xf32, #tpu.memory_space<vmem>>, %arg6: memref<1x128xf32, #tpu.memory_space<vmem>>, %arg7: memref<64x128xf32, #tpu.memory_space<vmem>>, %arg8: memref<64x32xf32, #tpu.memory_space<vmem>>) attributes {dimension_semantics = [], scalar_prefetch = 0 : i64, scratch_operands = 1 : i64, tpu.core_type = #tpu.core_type<tc>} {
    %c0 = arith.constant 0 : index
    %c0_0 = arith.constant 0 : index
    %0 = vector.load %arg0[%c0, %c0_0] : memref<64x64xf32, #tpu.memory_space<vmem>>, vector<64x64xf32>
    %c0_1 = arith.constant 0 : index
    %c0_2 = arith.constant 0 : index
    %1 = vector.load %arg2[%c0_1, %c0_2] : memref<64x128xf32, #tpu.memory_space<vmem>>, vector<64x128xf32>
    %cst = arith.constant dense<0.000000e+00> : vector<64x128xf32>
    %2 = tpu.matmul %0, %1, %cst {dimension_numbers = #tpu.dot_dimension_numbers<[1], [0], [0], [1], [0, 0, 1, 1], [], []>} : vector<64x64xf32>, vector<64x128xf32>, vector<64x128xf32> -> vector<64x128xf32>
    %c0_3 = arith.constant 0 : index
    %c0_4 = arith.constant 0 : index
    %3 = vector.load %arg3[%c0_3, %c0_4] : memref<1x128xf32, #tpu.memory_space<vmem>>, vector<1x128xf32>
    %4 = vector.broadcast %3 : vector<1x128xf32> to vector<64x128xf32>
    %5 = arith.addf %2, %4 : vector<64x128xf32>
    %c0_5 = arith.constant 0 : index
    %c0_6 = arith.constant 0 : index
    %6 = vector.load %arg4[%c0_5, %c0_6] : memref<32x128xf32, #tpu.memory_space<vmem>>, vector<32x128xf32>
    %c0_7 = arith.constant 0 : index
    %c0_8 = arith.constant 0 : index
    %7 = vector.load %arg1[%c0_7, %c0_8] : memref<8x1xi32, #tpu.memory_space<vmem>>, vector<8x1xi32>
    %8 = vector.shape_cast %7 : vector<8x1xi32> to vector<8x1xi32>
    %9 = vector.broadcast %8 : vector<8x1xi32> to vector<8x32xi32>
    %10 = tpu.iota {dimensions = array<i32: 1>} : vector<8x32xi32>
    %c16_i32 = arith.constant 16 : i32
    %11 = vector.broadcast %c16_i32 : i32 to vector<8x32xi32>
    %12 = arith.cmpi slt, %10, %11 : vector<8x32xi32>
    %cst_9 = arith.constant 0.000000e+00 : f32
    %13 = vector.broadcast %cst_9 : f32 to vector<8x32xf32>
    %cst_10 = arith.constant 0.000000e+00 : f32
    %14 = vector.broadcast %cst_10 : f32 to vector<8x32xf32>
    %15 = vector.extract_strided_slice %5 {offsets = [0, 0], sizes = [8, 128], strides = [1, 1]} : vector<64x128xf32> to vector<8x128xf32>
    %cst_11 = arith.constant dense<0.000000e+00> : vector<8x128xf32>
    %16 = tpu.matmul %13, %6, %cst_11 {dimension_numbers = #tpu.dot_dimension_numbers<[1], [0], [0], [1], [0, 0, 1, 1], [], []>} : vector<8x32xf32>, vector<32x128xf32>, vector<8x128xf32> -> vector<8x128xf32>
    %17 = arith.addf %15, %16 : vector<8x128xf32>
    %18 = vector.extract_strided_slice %17 {offsets = [0, 0], sizes = [8, 32], strides = [1, 1]} : vector<8x128xf32> to vector<8x32xf32>
    %19 = arith.negf %18 : vector<8x32xf32>
    %20 = math.exp %19 : vector<8x32xf32>
    %cst_12 = arith.constant 1.000000e+00 : f32
    %21 = vector.broadcast %cst_12 : f32 to vector<8x32xf32>
    %22 = arith.addf %21, %20 : vector<8x32xf32>
    %23 = arith.divf %21, %22 : vector<8x32xf32>
    %24 = vector.extract_strided_slice %17 {offsets = [0, 32], sizes = [8, 32], strides = [1, 1]} : vector<8x128xf32> to vector<8x32xf32>
    %25 = arith.negf %24 : vector<8x32xf32>
    %26 = math.exp %25 : vector<8x32xf32>
    %cst_13 = arith.constant 1.000000e+00 : f32
    %27 = vector.broadcast %cst_13 : f32 to vector<8x32xf32>
    %28 = arith.addf %27, %26 : vector<8x32xf32>
    %29 = arith.divf %27, %28 : vector<8x32xf32>
    %30 = vector.extract_strided_slice %17 {offsets = [0, 64], sizes = [8, 32], strides = [1, 1]} : vector<8x128xf32> to vector<8x32xf32>
    %31 = math.tanh %30 : vector<8x32xf32>
    %32 = vector.extract_strided_slice %17 {offsets = [0, 96], sizes = [8, 32], strides = [1, 1]} : vector<8x128xf32> to vector<8x32xf32>
    %33 = arith.negf %32 : vector<8x32xf32>
    %34 = math.exp %33 : vector<8x32xf32>
    %cst_14 = arith.constant 1.000000e+00 : f32
    %35 = vector.broadcast %cst_14 : f32 to vector<8x32xf32>
    %36 = arith.addf %35, %34 : vector<8x32xf32>
    %37 = arith.divf %35, %36 : vector<8x32xf32>
    %38 = arith.mulf %29, %14 : vector<8x32xf32>
    %39 = arith.mulf %23, %31 : vector<8x32xf32>
    %40 = arith.addf %38, %39 : vector<8x32xf32>
    %41 = math.tanh %40 : vector<8x32xf32>
    %42 = arith.mulf %37, %41 : vector<8x32xf32>
    %c0_i32 = arith.constant 0 : i32
    %c7_i32 = arith.constant 7 : i32
    %43 = vector.broadcast %c0_i32 : i32 to vector<8x32xi32>
    %44 = vector.broadcast %c7_i32 : i32 to vector<8x32xi32>
    %45 = arith.select %12, %43, %44 : vector<8x32xi1>, vector<8x32xi32>
    %46 = arith.cmpi slt, %45, %9 : vector<8x32xi32>
    %47 = arith.select %46, %42, %13 : vector<8x32xi1>, vector<8x32xf32>
    %48 = arith.select %46, %40, %14 : vector<8x32xi1>, vector<8x32xf32>
    %cst_15 = arith.constant 0.000000e+00 : f32
    %49 = vector.broadcast %cst_15 : f32 to vector<8x32xf32>
    %50 = arith.select %46, %42, %49 : vector<8x32xi1>, vector<8x32xf32>
    %51 = vector.extract_strided_slice %50 {offsets = [0, 0], sizes = [8, 16], strides = [1, 1]} : vector<8x32xf32> to vector<8x16xf32>
    %c0_16 = arith.constant 0 : index
    %c0_17 = arith.constant 0 : index
    %52 = vector.load %arg8[%c0_16, %c0_17] : memref<64x32xf32, #tpu.memory_space<vmem>>, vector<8x16xf32>
    tpu.vector_store %arg8[%c0_16, %c0_17], %51 {strides = array<i32>} : memref<64x32xf32, #tpu.memory_space<vmem>>, vector<8x16xf32>,
    %53 = vector.extract_strided_slice %50 {offsets = [0, 16], sizes = [8, 16], strides = [1, 1]} : vector<8x32xf32> to vector<8x16xf32>
    %c56 = arith.constant 56 : index
    %c16 = arith.constant 16 : index
    %54 = vector.load %arg8[%c56, %c16] : memref<64x32xf32, #tpu.memory_space<vmem>>, vector<8x16xf32>
    tpu.vector_store %arg8[%c56, %c16], %53 {strides = array<i32>} : memref<64x32xf32, #tpu.memory_space<vmem>>, vector<8x16xf32>,
    %55 = vector.extract_strided_slice %5 {offsets = [8, 0], sizes = [8, 128], strides = [1, 1]} : vector<64x128xf32> to vector<8x128xf32>
    %cst_18 = arith.constant dense<0.000000e+00> : vector<8x128xf32>
    %56 = tpu.matmul %47, %6, %cst_18 {dimension_numbers = #tpu.dot_dimension_numbers<[1], [0], [0], [1], [0, 0, 1, 1], [], []>} : vector<8x32xf32>, vector<32x128xf32>, vector<8x128xf32> -> vector<8x128xf32>
    %57 = arith.addf %55, %56 : vector<8x128xf32>
    %58 = vector.extract_strided_slice %57 {offsets = [0, 0], sizes = [8, 32], strides = [1, 1]} : vector<8x128xf32> to vector<8x32xf32>
    %59 = arith.negf %58 : vector<8x32xf32>
    %60 = math.exp %59 : vector<8x32xf32>
    %cst_19 = arith.constant 1.000000e+00 : f32
    %61 = vector.broadcast %cst_19 : f32 to vector<8x32xf32>
    %62 = arith.addf %61, %60 : vector<8x32xf32>
    %63 = arith.divf %61, %62 : vector<8x32xf32>
    %64 = vector.extract_strided_slice %57 {offsets = [0, 32], sizes = [8, 32], strides = [1, 1]} : vector<8x128xf32> to vector<8x32xf32>
    %65 = arith.negf %64 : vector<8x32xf32>
    %66 = math.exp %65 : vector<8x32xf32>
    %cst_20 = arith.constant 1.000000e+00 : f32
    %67 = vector.broadcast %cst_20 : f32 to vector<8x32xf32>
    %68 = arith.addf %67, %66 : vector<8x32xf32>
    %69 = arith.divf %67, %68 : vector<8x32xf32>
    %70 = vector.extract_strided_slice %57 {offsets = [0, 64], sizes = [8, 32], strides = [1, 1]} : vector<8x128xf32> to vector<8x32xf32>
    %71 = math.tanh %70 : vector<8x32xf32>
    %72 = vector.extract_strided_slice %57 {offsets = [0, 96], sizes = [8, 32], strides = [1, 1]} : vector<8x128xf32> to vector<8x32xf32>
    %73 = arith.negf %72 : vector<8x32xf32>
    %74 = math.exp %73 : vector<8x32xf32>
    %cst_21 = arith.constant 1.000000e+00 : f32
    %75 = vector.broadcast %cst_21 : f32 to vector<8x32xf32>
    %76 = arith.addf %75, %74 : vector<8x32xf32>
    %77 = arith.divf %75, %76 : vector<8x32xf32>
    %78 = arith.mulf %69, %48 : vector<8x32xf32>
    %79 = arith.mulf %63, %71 : vector<8x32xf32>
    %80 = arith.addf %78, %79 : vector<8x32xf32>
    %81 = math.tanh %80 : vector<8x32xf32>
    %82 = arith.mulf %77, %81 : vector<8x32xf32>
    %c1_i32 = arith.constant 1 : i32
    %c6_i32 = arith.constant 6 : i32
    %83 = vector.broadcast %c1_i32 : i32 to vector<8x32xi32>
    %84 = vector.broadcast %c6_i32 : i32 to vector<8x32xi32>
    %85 = arith.select %12, %83, %84 : vector<8x32xi1>, vector<8x32xi32>
    %86 = arith.cmpi slt, %85, %9 : vector<8x32xi32>
    %87 = arith.select %86, %82, %47 : vector<8x32xi1>, vector<8x32xf32>
    %88 = arith.select %86, %80, %48 : vector<8x32xi1>, vector<8x32xf32>
    %cst_22 = arith.constant 0.000000e+00 : f32
    %89 = vector.broadcast %cst_22 : f32 to vector<8x32xf32>
    %90 = arith.select %86, %82, %89 : vector<8x32xi1>, vector<8x32xf32>
    %91 = vector.extract_strided_slice %90 {offsets = [0, 0], sizes = [8, 16], strides = [1, 1]} : vector<8x32xf32> to vector<8x16xf32>
    %c8 = arith.constant 8 : index
    %c0_23 = arith.constant 0 : index
    %92 = vector.load %arg8[%c8, %c0_23] : memref<64x32xf32, #tpu.memory_space<vmem>>, vector<8x16xf32>
    tpu.vector_store %arg8[%c8, %c0_23], %91 {strides = array<i32>} : memref<64x32xf32, #tpu.memory_space<vmem>>, vector<8x16xf32>,
    %93 = vector.extract_strided_slice %90 {offsets = [0, 16], sizes = [8, 16], strides = [1, 1]} : vector<8x32xf32> to vector<8x16xf32>
    %c48 = arith.constant 48 : index
    %c16_24 = arith.constant 16 : index
    %94 = vector.load %arg8[%c48, %c16_24] : memref<64x32xf32, #tpu.memory_space<vmem>>, vector<8x16xf32>
    tpu.vector_store %arg8[%c48, %c16_24], %93 {strides = array<i32>} : memref<64x32xf32, #tpu.memory_space<vmem>>, vector<8x16xf32>,
    %95 = vector.extract_strided_slice %5 {offsets = [16, 0], sizes = [8, 128], strides = [1, 1]} : vector<64x128xf32> to vector<8x128xf32>
    %cst_25 = arith.constant dense<0.000000e+00> : vector<8x128xf32>
    %96 = tpu.matmul %87, %6, %cst_25 {dimension_numbers = #tpu.dot_dimension_numbers<[1], [0], [0], [1], [0, 0, 1, 1], [], []>} : vector<8x32xf32>, vector<32x128xf32>, vector<8x128xf32> -> vector<8x128xf32>
    %97 = arith.addf %95, %96 : vector<8x128xf32>
    %98 = vector.extract_strided_slice %97 {offsets = [0, 0], sizes = [8, 32], strides = [1, 1]} : vector<8x128xf32> to vector<8x32xf32>
    %99 = arith.negf %98 : vector<8x32xf32>
    %100 = math.exp %99 : vector<8x32xf32>
    %cst_26 = arith.constant 1.000000e+00 : f32
    %101 = vector.broadcast %cst_26 : f32 to vector<8x32xf32>
    %102 = arith.addf %101, %100 : vector<8x32xf32>
    %103 = arith.divf %101, %102 : vector<8x32xf32>
    %104 = vector.extract_strided_slice %97 {offsets = [0, 32], sizes = [8, 32], strides = [1, 1]} : vector<8x128xf32> to vector<8x32xf32>
    %105 = arith.negf %104 : vector<8x32xf32>
    %106 = math.exp %105 : vector<8x32xf32>
    %cst_27 = arith.constant 1.000000e+00 : f32
    %107 = vector.broadcast %cst_27 : f32 to vector<8x32xf32>
    %108 = arith.addf %107, %106 : vector<8x32xf32>
    %109 = arith.divf %107, %108 : vector<8x32xf32>
    %110 = vector.extract_strided_slice %97 {offsets = [0, 64], sizes = [8, 32], strides = [1, 1]} : vector<8x128xf32> to vector<8x32xf32>
    %111 = math.tanh %110 : vector<8x32xf32>
    %112 = vector.extract_strided_slice %97 {offsets = [0, 96], sizes = [8, 32], strides = [1, 1]} : vector<8x128xf32> to vector<8x32xf32>
    %113 = arith.negf %112 : vector<8x32xf32>
    %114 = math.exp %113 : vector<8x32xf32>
    %cst_28 = arith.constant 1.000000e+00 : f32
    %115 = vector.broadcast %cst_28 : f32 to vector<8x32xf32>
    %116 = arith.addf %115, %114 : vector<8x32xf32>
    %117 = arith.divf %115, %116 : vector<8x32xf32>
    %118 = arith.mulf %109, %88 : vector<8x32xf32>
    %119 = arith.mulf %103, %111 : vector<8x32xf32>
    %120 = arith.addf %118, %119 : vector<8x32xf32>
    %121 = math.tanh %120 : vector<8x32xf32>
    %122 = arith.mulf %117, %121 : vector<8x32xf32>
    %c2_i32 = arith.constant 2 : i32
    %c5_i32 = arith.constant 5 : i32
    %123 = vector.broadcast %c2_i32 : i32 to vector<8x32xi32>
    %124 = vector.broadcast %c5_i32 : i32 to vector<8x32xi32>
    %125 = arith.select %12, %123, %124 : vector<8x32xi1>, vector<8x32xi32>
    %126 = arith.cmpi slt, %125, %9 : vector<8x32xi32>
    %127 = arith.select %126, %122, %87 : vector<8x32xi1>, vector<8x32xf32>
    %128 = arith.select %126, %120, %88 : vector<8x32xi1>, vector<8x32xf32>
    %cst_29 = arith.constant 0.000000e+00 : f32
    %129 = vector.broadcast %cst_29 : f32 to vector<8x32xf32>
    %130 = arith.select %126, %122, %129 : vector<8x32xi1>, vector<8x32xf32>
    %131 = vector.extract_strided_slice %130 {offsets = [0, 0], sizes = [8, 16], strides = [1, 1]} : vector<8x32xf32> to vector<8x16xf32>
    %c16_30 = arith.constant 16 : index
    %c0_31 = arith.constant 0 : index
    %132 = vector.load %arg8[%c16_30, %c0_31] : memref<64x32xf32, #tpu.memory_space<vmem>>, vector<8x16xf32>
    tpu.vector_store %arg8[%c16_30, %c0_31], %131 {strides = array<i32>} : memref<64x32xf32, #tpu.memory_space<vmem>>, vector<8x16xf32>,
    %133 = vector.extract_strided_slice %130 {offsets = [0, 16], sizes = [8, 16], strides = [1, 1]} : vector<8x32xf32> to vector<8x16xf32>
    %c40 = arith.constant 40 : index
    %c16_32 = arith.constant 16 : index
    %134 = vector.load %arg8[%c40, %c16_32] : memref<64x32xf32, #tpu.memory_space<vmem>>, vector<8x16xf32>
    tpu.vector_store %arg8[%c40, %c16_32], %133 {strides = array<i32>} : memref<64x32xf32, #tpu.memory_space<vmem>>, vector<8x16xf32>,
    %135 = vector.extract_strided_slice %5 {offsets = [24, 0], sizes = [8, 128], strides = [1, 1]} : vector<64x128xf32> to vector<8x128xf32>
    %cst_33 = arith.constant dense<0.000000e+00> : vector<8x128xf32>
    %136 = tpu.matmul %127, %6, %cst_33 {dimension_numbers = #tpu.dot_dimension_numbers<[1], [0], [0], [1], [0, 0, 1, 1], [], []>} : vector<8x32xf32>, vector<32x128xf32>, vector<8x128xf32> -> vector<8x128xf32>
    %137 = arith.addf %135, %136 : vector<8x128xf32>
    %138 = vector.extract_strided_slice %137 {offsets = [0, 0], sizes = [8, 32], strides = [1, 1]} : vector<8x128xf32> to vector<8x32xf32>
    %139 = arith.negf %138 : vector<8x32xf32>
    %140 = math.exp %139 : vector<8x32xf32>
    %cst_34 = arith.constant 1.000000e+00 : f32
    %141 = vector.broadcast %cst_34 : f32 to vector<8x32xf32>
    %142 = arith.addf %141, %140 : vector<8x32xf32>
    %143 = arith.divf %141, %142 : vector<8x32xf32>
    %144 = vector.extract_strided_slice %137 {offsets = [0, 32], sizes = [8, 32], strides = [1, 1]} : vector<8x128xf32> to vector<8x32xf32>
    %145 = arith.negf %144 : vector<8x32xf32>
    %146 = math.exp %145 : vector<8x32xf32>
    %cst_35 = arith.constant 1.000000e+00 : f32
    %147 = vector.broadcast %cst_35 : f32 to vector<8x32xf32>
    %148 = arith.addf %147, %146 : vector<8x32xf32>
    %149 = arith.divf %147, %148 : vector<8x32xf32>
    %150 = vector.extract_strided_slice %137 {offsets = [0, 64], sizes = [8, 32], strides = [1, 1]} : vector<8x128xf32> to vector<8x32xf32>
    %151 = math.tanh %150 : vector<8x32xf32>
    %152 = vector.extract_strided_slice %137 {offsets = [0, 96], sizes = [8, 32], strides = [1, 1]} : vector<8x128xf32> to vector<8x32xf32>
    %153 = arith.negf %152 : vector<8x32xf32>
    %154 = math.exp %153 : vector<8x32xf32>
    %cst_36 = arith.constant 1.000000e+00 : f32
    %155 = vector.broadcast %cst_36 : f32 to vector<8x32xf32>
    %156 = arith.addf %155, %154 : vector<8x32xf32>
    %157 = arith.divf %155, %156 : vector<8x32xf32>
    %158 = arith.mulf %149, %128 : vector<8x32xf32>
    %159 = arith.mulf %143, %151 : vector<8x32xf32>
    %160 = arith.addf %158, %159 : vector<8x32xf32>
    %161 = math.tanh %160 : vector<8x32xf32>
    %162 = arith.mulf %157, %161 : vector<8x32xf32>
    %c3_i32 = arith.constant 3 : i32
    %c4_i32 = arith.constant 4 : i32
    %163 = vector.broadcast %c3_i32 : i32 to vector<8x32xi32>
    %164 = vector.broadcast %c4_i32 : i32 to vector<8x32xi32>
    %165 = arith.select %12, %163, %164 : vector<8x32xi1>, vector<8x32xi32>
    %166 = arith.cmpi slt, %165, %9 : vector<8x32xi32>
    %167 = arith.select %166, %162, %127 : vector<8x32xi1>, vector<8x32xf32>
    %168 = arith.select %166, %160, %128 : vector<8x32xi1>, vector<8x32xf32>
    %cst_37 = arith.constant 0.000000e+00 : f32
    %169 = vector.broadcast %cst_37 : f32 to vector<8x32xf32>
    %170 = arith.select %166, %162, %169 : vector<8x32xi1>, vector<8x32xf32>
    %171 = vector.extract_strided_slice %170 {offsets = [0, 0], sizes = [8, 16], strides = [1, 1]} : vector<8x32xf32> to vector<8x16xf32>
    %c24 = arith.constant 24 : index
    %c0_38 = arith.constant 0 : index
    %172 = vector.load %arg8[%c24, %c0_38] : memref<64x32xf32, #tpu.memory_space<vmem>>, vector<8x16xf32>
    tpu.vector_store %arg8[%c24, %c0_38], %171 {strides = array<i32>} : memref<64x32xf32, #tpu.memory_space<vmem>>, vector<8x16xf32>,
    %173 = vector.extract_strided_slice %170 {offsets = [0, 16], sizes = [8, 16], strides = [1, 1]} : vector<8x32xf32> to vector<8x16xf32>
    %c32 = arith.constant 32 : index
    %c16_39 = arith.constant 16 : index
    %174 = vector.load %arg8[%c32, %c16_39] : memref<64x32xf32, #tpu.memory_space<vmem>>, vector<8x16xf32>
    tpu.vector_store %arg8[%c32, %c16_39], %173 {strides = array<i32>} : memref<64x32xf32, #tpu.memory_space<vmem>>, vector<8x16xf32>,
    %175 = vector.extract_strided_slice %5 {offsets = [32, 0], sizes = [8, 128], strides = [1, 1]} : vector<64x128xf32> to vector<8x128xf32>
    %cst_40 = arith.constant dense<0.000000e+00> : vector<8x128xf32>
    %176 = tpu.matmul %167, %6, %cst_40 {dimension_numbers = #tpu.dot_dimension_numbers<[1], [0], [0], [1], [0, 0, 1, 1], [], []>} : vector<8x32xf32>, vector<32x128xf32>, vector<8x128xf32> -> vector<8x128xf32>
    %177 = arith.addf %175, %176 : vector<8x128xf32>
    %178 = vector.extract_strided_slice %177 {offsets = [0, 0], sizes = [8, 32], strides = [1, 1]} : vector<8x128xf32> to vector<8x32xf32>
    %179 = arith.negf %178 : vector<8x32xf32>
    %180 = math.exp %179 : vector<8x32xf32>
    %cst_41 = arith.constant 1.000000e+00 : f32
    %181 = vector.broadcast %cst_41 : f32 to vector<8x32xf32>
    %182 = arith.addf %181, %180 : vector<8x32xf32>
    %183 = arith.divf %181, %182 : vector<8x32xf32>
    %184 = vector.extract_strided_slice %177 {offsets = [0, 32], sizes = [8, 32], strides = [1, 1]} : vector<8x128xf32> to vector<8x32xf32>
    %185 = arith.negf %184 : vector<8x32xf32>
    %186 = math.exp %185 : vector<8x32xf32>
    %cst_42 = arith.constant 1.000000e+00 : f32
    %187 = vector.broadcast %cst_42 : f32 to vector<8x32xf32>
    %188 = arith.addf %187, %186 : vector<8x32xf32>
    %189 = arith.divf %187, %188 : vector<8x32xf32>
    %190 = vector.extract_strided_slice %177 {offsets = [0, 64], sizes = [8, 32], strides = [1, 1]} : vector<8x128xf32> to vector<8x32xf32>
    %191 = math.tanh %190 : vector<8x32xf32>
    %192 = vector.extract_strided_slice %177 {offsets = [0, 96], sizes = [8, 32], strides = [1, 1]} : vector<8x128xf32> to vector<8x32xf32>
    %193 = arith.negf %192 : vector<8x32xf32>
    %194 = math.exp %193 : vector<8x32xf32>
    %cst_43 = arith.constant 1.000000e+00 : f32
    %195 = vector.broadcast %cst_43 : f32 to vector<8x32xf32>
    %196 = arith.addf %195, %194 : vector<8x32xf32>
    %197 = arith.divf %195, %196 : vector<8x32xf32>
    %198 = arith.mulf %189, %168 : vector<8x32xf32>
    %199 = arith.mulf %183, %191 : vector<8x32xf32>
    %200 = arith.addf %198, %199 : vector<8x32xf32>
    %201 = math.tanh %200 : vector<8x32xf32>
    %202 = arith.mulf %197, %201 : vector<8x32xf32>
    %c4_i32_44 = arith.constant 4 : i32
    %c3_i32_45 = arith.constant 3 : i32
    %203 = vector.broadcast %c4_i32_44 : i32 to vector<8x32xi32>
    %204 = vector.broadcast %c3_i32_45 : i32 to vector<8x32xi32>
    %205 = arith.select %12, %203, %204 : vector<8x32xi1>, vector<8x32xi32>
    %206 = arith.cmpi slt, %205, %9 : vector<8x32xi32>
    %207 = arith.select %206, %202, %167 : vector<8x32xi1>, vector<8x32xf32>
    %208 = arith.select %206, %200, %168 : vector<8x32xi1>, vector<8x32xf32>
    %cst_46 = arith.constant 0.000000e+00 : f32
    %209 = vector.broadcast %cst_46 : f32 to vector<8x32xf32>
    %210 = arith.select %206, %202, %209 : vector<8x32xi1>, vector<8x32xf32>
    %211 = vector.extract_strided_slice %210 {offsets = [0, 0], sizes = [8, 16], strides = [1, 1]} : vector<8x32xf32> to vector<8x16xf32>
    %c32_47 = arith.constant 32 : index
    %c0_48 = arith.constant 0 : index
    %212 = vector.load %arg8[%c32_47, %c0_48] : memref<64x32xf32, #tpu.memory_space<vmem>>, vector<8x16xf32>
    tpu.vector_store %arg8[%c32_47, %c0_48], %211 {strides = array<i32>} : memref<64x32xf32, #tpu.memory_space<vmem>>, vector<8x16xf32>,
    %213 = vector.extract_strided_slice %210 {offsets = [0, 16], sizes = [8, 16], strides = [1, 1]} : vector<8x32xf32> to vector<8x16xf32>
    %c24_49 = arith.constant 24 : index
    %c16_50 = arith.constant 16 : index
    %214 = vector.load %arg8[%c24_49, %c16_50] : memref<64x32xf32, #tpu.memory_space<vmem>>, vector<8x16xf32>
    tpu.vector_store %arg8[%c24_49, %c16_50], %213 {strides = array<i32>} : memref<64x32xf32, #tpu.memory_space<vmem>>, vector<8x16xf32>,
    %215 = vector.extract_strided_slice %5 {offsets = [40, 0], sizes = [8, 128], strides = [1, 1]} : vector<64x128xf32> to vector<8x128xf32>
    %cst_51 = arith.constant dense<0.000000e+00> : vector<8x128xf32>
    %216 = tpu.matmul %207, %6, %cst_51 {dimension_numbers = #tpu.dot_dimension_numbers<[1], [0], [0], [1], [0, 0, 1, 1], [], []>} : vector<8x32xf32>, vector<32x128xf32>, vector<8x128xf32> -> vector<8x128xf32>
    %217 = arith.addf %215, %216 : vector<8x128xf32>
    %218 = vector.extract_strided_slice %217 {offsets = [0, 0], sizes = [8, 32], strides = [1, 1]} : vector<8x128xf32> to vector<8x32xf32>
    %219 = arith.negf %218 : vector<8x32xf32>
    %220 = math.exp %219 : vector<8x32xf32>
    %cst_52 = arith.constant 1.000000e+00 : f32
    %221 = vector.broadcast %cst_52 : f32 to vector<8x32xf32>
    %222 = arith.addf %221, %220 : vector<8x32xf32>
    %223 = arith.divf %221, %222 : vector<8x32xf32>
    %224 = vector.extract_strided_slice %217 {offsets = [0, 32], sizes = [8, 32], strides = [1, 1]} : vector<8x128xf32> to vector<8x32xf32>
    %225 = arith.negf %224 : vector<8x32xf32>
    %226 = math.exp %225 : vector<8x32xf32>
    %cst_53 = arith.constant 1.000000e+00 : f32
    %227 = vector.broadcast %cst_53 : f32 to vector<8x32xf32>
    %228 = arith.addf %227, %226 : vector<8x32xf32>
    %229 = arith.divf %227, %228 : vector<8x32xf32>
    %230 = vector.extract_strided_slice %217 {offsets = [0, 64], sizes = [8, 32], strides = [1, 1]} : vector<8x128xf32> to vector<8x32xf32>
    %231 = math.tanh %230 : vector<8x32xf32>
    %232 = vector.extract_strided_slice %217 {offsets = [0, 96], sizes = [8, 32], strides = [1, 1]} : vector<8x128xf32> to vector<8x32xf32>
    %233 = arith.negf %232 : vector<8x32xf32>
    %234 = math.exp %233 : vector<8x32xf32>
    %cst_54 = arith.constant 1.000000e+00 : f32
    %235 = vector.broadcast %cst_54 : f32 to vector<8x32xf32>
    %236 = arith.addf %235, %234 : vector<8x32xf32>
    %237 = arith.divf %235, %236 : vector<8x32xf32>
    %238 = arith.mulf %229, %208 : vector<8x32xf32>
    %239 = arith.mulf %223, %231 : vector<8x32xf32>
    %240 = arith.addf %238, %239 : vector<8x32xf32>
    %241 = math.tanh %240 : vector<8x32xf32>
    %242 = arith.mulf %237, %241 : vector<8x32xf32>
    %c5_i32_55 = arith.constant 5 : i32
    %c2_i32_56 = arith.constant 2 : i32
    %243 = vector.broadcast %c5_i32_55 : i32 to vector<8x32xi32>
    %244 = vector.broadcast %c2_i32_56 : i32 to vector<8x32xi32>
    %245 = arith.select %12, %243, %244 : vector<8x32xi1>, vector<8x32xi32>
    %246 = arith.cmpi slt, %245, %9 : vector<8x32xi32>
    %247 = arith.select %246, %242, %207 : vector<8x32xi1>, vector<8x32xf32>
    %248 = arith.select %246, %240, %208 : vector<8x32xi1>, vector<8x32xf32>
    %cst_57 = arith.constant 0.000000e+00 : f32
    %249 = vector.broadcast %cst_57 : f32 to vector<8x32xf32>
    %250 = arith.select %246, %242, %249 : vector<8x32xi1>, vector<8x32xf32>
    %251 = vector.extract_strided_slice %250 {offsets = [0, 0], sizes = [8, 16], strides = [1, 1]} : vector<8x32xf32> to vector<8x16xf32>
    %c40_58 = arith.constant 40 : index
    %c0_59 = arith.constant 0 : index
    %252 = vector.load %arg8[%c40_58, %c0_59] : memref<64x32xf32, #tpu.memory_space<vmem>>, vector<8x16xf32>
    tpu.vector_store %arg8[%c40_58, %c0_59], %251 {strides = array<i32>} : memref<64x32xf32, #tpu.memory_space<vmem>>, vector<8x16xf32>,
    %253 = vector.extract_strided_slice %250 {offsets = [0, 16], sizes = [8, 16], strides = [1, 1]} : vector<8x32xf32> to vector<8x16xf32>
    %c16_60 = arith.constant 16 : index
    %c16_61 = arith.constant 16 : index
    %254 = vector.load %arg8[%c16_60, %c16_61] : memref<64x32xf32, #tpu.memory_space<vmem>>, vector<8x16xf32>
    tpu.vector_store %arg8[%c16_60, %c16_61], %253 {strides = array<i32>} : memref<64x32xf32, #tpu.memory_space<vmem>>, vector<8x16xf32>,
    %255 = vector.extract_strided_slice %5 {offsets = [48, 0], sizes = [8, 128], strides = [1, 1]} : vector<64x128xf32> to vector<8x128xf32>
    %cst_62 = arith.constant dense<0.000000e+00> : vector<8x128xf32>
    %256 = tpu.matmul %247, %6, %cst_62 {dimension_numbers = #tpu.dot_dimension_numbers<[1], [0], [0], [1], [0, 0, 1, 1], [], []>} : vector<8x32xf32>, vector<32x128xf32>, vector<8x128xf32> -> vector<8x128xf32>
    %257 = arith.addf %255, %256 : vector<8x128xf32>
    %258 = vector.extract_strided_slice %257 {offsets = [0, 0], sizes = [8, 32], strides = [1, 1]} : vector<8x128xf32> to vector<8x32xf32>
    %259 = arith.negf %258 : vector<8x32xf32>
    %260 = math.exp %259 : vector<8x32xf32>
    %cst_63 = arith.constant 1.000000e+00 : f32
    %261 = vector.broadcast %cst_63 : f32 to vector<8x32xf32>
    %262 = arith.addf %261, %260 : vector<8x32xf32>
    %263 = arith.divf %261, %262 : vector<8x32xf32>
    %264 = vector.extract_strided_slice %257 {offsets = [0, 32], sizes = [8, 32], strides = [1, 1]} : vector<8x128xf32> to vector<8x32xf32>
    %265 = arith.negf %264 : vector<8x32xf32>
    %266 = math.exp %265 : vector<8x32xf32>
    %cst_64 = arith.constant 1.000000e+00 : f32
    %267 = vector.broadcast %cst_64 : f32 to vector<8x32xf32>
    %268 = arith.addf %267, %266 : vector<8x32xf32>
    %269 = arith.divf %267, %268 : vector<8x32xf32>
    %270 = vector.extract_strided_slice %257 {offsets = [0, 64], sizes = [8, 32], strides = [1, 1]} : vector<8x128xf32> to vector<8x32xf32>
    %271 = math.tanh %270 : vector<8x32xf32>
    %272 = vector.extract_strided_slice %257 {offsets = [0, 96], sizes = [8, 32], strides = [1, 1]} : vector<8x128xf32> to vector<8x32xf32>
    %273 = arith.negf %272 : vector<8x32xf32>
    %274 = math.exp %273 : vector<8x32xf32>
    %cst_65 = arith.constant 1.000000e+00 : f32
    %275 = vector.broadcast %cst_65 : f32 to vector<8x32xf32>
    %276 = arith.addf %275, %274 : vector<8x32xf32>
    %277 = arith.divf %275, %276 : vector<8x32xf32>
    %278 = arith.mulf %269, %248 : vector<8x32xf32>
    %279 = arith.mulf %263, %271 : vector<8x32xf32>
    %280 = arith.addf %278, %279 : vector<8x32xf32>
    %281 = math.tanh %280 : vector<8x32xf32>
    %282 = arith.mulf %277, %281 : vector<8x32xf32>
    %c6_i32_66 = arith.constant 6 : i32
    %c1_i32_67 = arith.constant 1 : i32
    %283 = vector.broadcast %c6_i32_66 : i32 to vector<8x32xi32>
    %284 = vector.broadcast %c1_i32_67 : i32 to vector<8x32xi32>
    %285 = arith.select %12, %283, %284 : vector<8x32xi1>, vector<8x32xi32>
    %286 = arith.cmpi slt, %285, %9 : vector<8x32xi32>
    %287 = arith.select %286, %282, %247 : vector<8x32xi1>, vector<8x32xf32>
    %288 = arith.select %286, %280, %248 : vector<8x32xi1>, vector<8x32xf32>
    %cst_68 = arith.constant 0.000000e+00 : f32
    %289 = vector.broadcast %cst_68 : f32 to vector<8x32xf32>
    %290 = arith.select %286, %282, %289 : vector<8x32xi1>, vector<8x32xf32>
    %291 = vector.extract_strided_slice %290 {offsets = [0, 0], sizes = [8, 16], strides = [1, 1]} : vector<8x32xf32> to vector<8x16xf32>
    %c48_69 = arith.constant 48 : index
    %c0_70 = arith.constant 0 : index
    %292 = vector.load %arg8[%c48_69, %c0_70] : memref<64x32xf32, #tpu.memory_space<vmem>>, vector<8x16xf32>
    tpu.vector_store %arg8[%c48_69, %c0_70], %291 {strides = array<i32>} : memref<64x32xf32, #tpu.memory_space<vmem>>, vector<8x16xf32>,
    %293 = vector.extract_strided_slice %290 {offsets = [0, 16], sizes = [8, 16], strides = [1, 1]} : vector<8x32xf32> to vector<8x16xf32>
    %c8_71 = arith.constant 8 : index
    %c16_72 = arith.constant 16 : index
    %294 = vector.load %arg8[%c8_71, %c16_72] : memref<64x32xf32, #tpu.memory_space<vmem>>, vector<8x16xf32>
    tpu.vector_store %arg8[%c8_71, %c16_72], %293 {strides = array<i32>} : memref<64x32xf32, #tpu.memory_space<vmem>>, vector<8x16xf32>,
    %295 = vector.extract_strided_slice %5 {offsets = [56, 0], sizes = [8, 128], strides = [1, 1]} : vector<64x128xf32> to vector<8x128xf32>
    %cst_73 = arith.constant dense<0.000000e+00> : vector<8x128xf32>
    %296 = tpu.matmul %287, %6, %cst_73 {dimension_numbers = #tpu.dot_dimension_numbers<[1], [0], [0], [1], [0, 0, 1, 1], [], []>} : vector<8x32xf32>, vector<32x128xf32>, vector<8x128xf32> -> vector<8x128xf32>
    %297 = arith.addf %295, %296 : vector<8x128xf32>
    %298 = vector.extract_strided_slice %297 {offsets = [0, 0], sizes = [8, 32], strides = [1, 1]} : vector<8x128xf32> to vector<8x32xf32>
    %299 = arith.negf %298 : vector<8x32xf32>
    %300 = math.exp %299 : vector<8x32xf32>
    %cst_74 = arith.constant 1.000000e+00 : f32
    %301 = vector.broadcast %cst_74 : f32 to vector<8x32xf32>
    %302 = arith.addf %301, %300 : vector<8x32xf32>
    %303 = arith.divf %301, %302 : vector<8x32xf32>
    %304 = vector.extract_strided_slice %297 {offsets = [0, 32], sizes = [8, 32], strides = [1, 1]} : vector<8x128xf32> to vector<8x32xf32>
    %305 = arith.negf %304 : vector<8x32xf32>
    %306 = math.exp %305 : vector<8x32xf32>
    %cst_75 = arith.constant 1.000000e+00 : f32
    %307 = vector.broadcast %cst_75 : f32 to vector<8x32xf32>
    %308 = arith.addf %307, %306 : vector<8x32xf32>
    %309 = arith.divf %307, %308 : vector<8x32xf32>
    %310 = vector.extract_strided_slice %297 {offsets = [0, 64], sizes = [8, 32], strides = [1, 1]} : vector<8x128xf32> to vector<8x32xf32>
    %311 = math.tanh %310 : vector<8x32xf32>
    %312 = vector.extract_strided_slice %297 {offsets = [0, 96], sizes = [8, 32], strides = [1, 1]} : vector<8x128xf32> to vector<8x32xf32>
    %313 = arith.negf %312 : vector<8x32xf32>
    %314 = math.exp %313 : vector<8x32xf32>
    %cst_76 = arith.constant 1.000000e+00 : f32
    %315 = vector.broadcast %cst_76 : f32 to vector<8x32xf32>
    %316 = arith.addf %315, %314 : vector<8x32xf32>
    %317 = arith.divf %315, %316 : vector<8x32xf32>
    %318 = arith.mulf %309, %288 : vector<8x32xf32>
    %319 = arith.mulf %303, %311 : vector<8x32xf32>
    %320 = arith.addf %318, %319 : vector<8x32xf32>
    %321 = math.tanh %320 : vector<8x32xf32>
    %322 = arith.mulf %317, %321 : vector<8x32xf32>
    %c7_i32_77 = arith.constant 7 : i32
    %c0_i32_78 = arith.constant 0 : i32
    %323 = vector.broadcast %c7_i32_77 : i32 to vector<8x32xi32>
    %324 = vector.broadcast %c0_i32_78 : i32 to vector<8x32xi32>
    %325 = arith.select %12, %323, %324 : vector<8x32xi1>, vector<8x32xi32>
    %326 = arith.cmpi slt, %325, %9 : vector<8x32xi32>
    %cst_79 = arith.constant 0.000000e+00 : f32
    %327 = vector.broadcast %cst_79 : f32 to vector<8x32xf32>
    %328 = arith.select %326, %322, %327 : vector<8x32xi1>, vector<8x32xf32>
    %329 = vector.extract_strided_slice %328 {offsets = [0, 0], sizes = [8, 16], strides = [1, 1]} : vector<8x32xf32> to vector<8x16xf32>
    %c56_80 = arith.constant 56 : index
    %c0_81 = arith.constant 0 : index
    %330 = vector.load %arg8[%c56_80, %c0_81] : memref<64x32xf32, #tpu.memory_space<vmem>>, vector<8x16xf32>
    tpu.vector_store %arg8[%c56_80, %c0_81], %329 {strides = array<i32>} : memref<64x32xf32, #tpu.memory_space<vmem>>, vector<8x16xf32>,
    %331 = vector.extract_strided_slice %328 {offsets = [0, 16], sizes = [8, 16], strides = [1, 1]} : vector<8x32xf32> to vector<8x16xf32>
    %c0_82 = arith.constant 0 : index
    %c16_83 = arith.constant 16 : index
    %332 = vector.load %arg8[%c0_82, %c16_83] : memref<64x32xf32, #tpu.memory_space<vmem>>, vector<8x16xf32>
    tpu.vector_store %arg8[%c0_82, %c16_83], %331 {strides = array<i32>} : memref<64x32xf32, #tpu.memory_space<vmem>>, vector<8x16xf32>,
    %c0_84 = arith.constant 0 : index
    %c0_85 = arith.constant 0 : index
    %333 = vector.load %arg8[%c0_84, %c0_85] : memref<64x32xf32, #tpu.memory_space<vmem>>, vector<64x32xf32>
    %c0_86 = arith.constant 0 : index
    %c0_87 = arith.constant 0 : index
    %334 = vector.load %arg5[%c0_86, %c0_87] : memref<32x128xf32, #tpu.memory_space<vmem>>, vector<32x128xf32>
    %cst_88 = arith.constant dense<0.000000e+00> : vector<64x128xf32>
    %335 = tpu.matmul %333, %334, %cst_88 {dimension_numbers = #tpu.dot_dimension_numbers<[1], [0], [0], [1], [0, 0, 1, 1], [], []>} : vector<64x32xf32>, vector<32x128xf32>, vector<64x128xf32> -> vector<64x128xf32>
    %c0_89 = arith.constant 0 : index
    %c0_90 = arith.constant 0 : index
    %336 = vector.load %arg6[%c0_89, %c0_90] : memref<1x128xf32, #tpu.memory_space<vmem>>, vector<1x128xf32>
    %337 = vector.broadcast %336 : vector<1x128xf32> to vector<64x128xf32>
    %338 = arith.addf %335, %337 : vector<64x128xf32>
    %c0_91 = arith.constant 0 : index
    %c0_92 = arith.constant 0 : index
    %339 = vector.load %arg7[%c0_91, %c0_92] : memref<64x128xf32, #tpu.memory_space<vmem>>, vector<64x128xf32>
    tpu.vector_store %arg7[%c0_91, %c0_92], %338 {strides = array<i32>} : memref<64x128xf32, #tpu.memory_space<vmem>>, vector<64x128xf32>,
    return
  }
}

</mosaic_0001>

<bundles_post_ra>
// kernel: word_sequence_forward.1
= control target key start
LH: loop header
LB: loop body
LE: loop exit
PB: predicated region body
PF: predicated region fallthrough
CT: control target
= control target key end

     0   :  { %v971_v11 = vmov 0.0   ;;  %vm46_vm0 = vcmask 523264   ;;  %s972_s27 = smov 64   ;;  %v974_v35 = vmov 0   ;;  %v120_v46 = vlaneseq  ;;  %s1335_s2 = inlined_call_operand.vmem [shape: f32[64,128], index: 2, kind: input, shape index: {}]   ;;  %s1336_s4 = inlined_call_operand.vmem [shape: f32[32,128], index: 4, kind: input, shape index: {}]   ;;  %s1337_s3 = inlined_call_operand.vmem [shape: f32[1,128], index: 3, kind: input, shape index: {}]   ;;  %s1338_s0 = inlined_call_operand.vmem [shape: f32[64,64], index: 0, kind: input, shape index: {}]   ;;  %s1339_s1 = inlined_call_operand.vmem [shape: s32[8,1], index: 1, kind: input, shape index: {}]   ;;  %s1340_s5 = inlined_call_operand.vmem [shape: f32[32,128], index: 5, kind: input, shape index: {}]   ;;  %s1341_s6 = inlined_call_operand.vmem [shape: f32[1,128], index: 6, kind: input, shape index: {}]   ;;  %s1342_s7 = inlined_call_operand.vmem [shape: f32[64,128], index: 7, kind: output, shape index: {}]  }
   0x1   :  { %v41_v0 = vld [vmem:[%s1335_s2 + $0x38] sm:$0xff]  ;;  %v40_v1 = vld [vmem:[%s1335_s2 + $0x30] sm:$0xff]  ;;  %v39_v2 = vld [vmem:[%s1335_s2 + $0x28] sm:$0xff]  ;;  %903 = vset.pattern.permute.xlu1 %v974_v35  ;;  %904 = vset.pattern.permute.xlu0 %v974_v35  ;;  %v976_v49 = vmov 7   ;;  %vm197_vm7 = vcmask 130048   ;;  %vm123_vm8 = vcmask 261120  }
   0x2   :  { %79 = vmatpush.msra.mxu0 %v41_v0  ;;  %879 = vmatpush.msra.mxu2 %v41_v0  ;;  %v1035_v3 = vld [vmem:[%s1336_s4 + $0x18] sm:$0xff]  ;;  %v1040_v4 = vld [vmem:[%s1336_s4 + $0x10] sm:$0xff]  ;;  %v38_v5 = vld [vmem:[%s1335_s2 + $0x20] sm:$0xff]  ;;  %v1127_v47 = vand.u32 127, %v120_v46  ;;  %vm199_vm9 = vcmask 261248  }
   0x3   :  { %139 = vmatpush.msra.mxu1 %v1035_v3  ;;  %v1049_v6 = vld [vmem:[%s1336_s4 + $0x8] sm:$0xff]  ;;  %296 = vmatpush.msra.mxu3 %v1035_v3  ;;  %v37_v7 = vld [vmem:[%s1335_s2 + $0x18] sm:$0xff]  ;;  %v1059_v8 = vld [vmem:[%s1336_s4] sm:$0xff] }
   0x4   :  { %80 = vmatpush.msra.mxu0 %v40_v1  ;;  %880 = vmatpush.msra.mxu2 %v40_v1  ;;  %v36_v9 = vld [vmem:[%s1335_s2 + $0x10] sm:$0xff]  ;;  %v35_v10 = vld [vmem:[%s1335_s2 + $0x8] sm:$0xff]  ;;  %v34_v12 = vld [vmem:[%s1335_s2] sm:$0xff]  ;;  %vm122_vm5 = vcmp.lt.s32.totalorder %v1127_v47, 16 }
   0x5   :  { %140 = vmatpush.msra.mxu1 %v1040_v4  ;;  %297 = vmatpush.msra.mxu3 %v1040_v4  ;;  %v26_v13 = vld [vmem:[%s1338_s0] sm:$0xff]  ;;  %v32_v41 = vld [vmem:[%s1338_s0 + $0x30] sm:$0xff]  ;;  %v33_v42 = vld [vmem:[%s1338_s0 + $0x38] sm:$0xff]  ;;  %v185_v50 = vsel %vm122_vm5, 0, %v976_v49 }
   0x6   :  { %81 = vmatpush.msra.mxu0 %v39_v2  ;;  %881 = vmatpush.msra.mxu2 %v39_v2  ;;  %v1098_v14 = vld [vmem:[%s1337_s3] ss:$0 sm:$0xff]  ;;  %s973_s3 = smov 32   ;;  %v27_v45 = vld [vmem:[%s1338_s0 + $0x8] sm:$0xff] }
   0x7   :  { %141 = vmatpush.msra.mxu1 %v1049_v6  ;;  %298 = vmatpush.msra.mxu3 %v1049_v6  ;;  %v116_v40 = vld [vmem:[%s1339_s1] sm:$0xff]  ;;  %s975_s1 = smov 96  }
   0x8   :  { %82 = vmatpush.msra.mxu0 %v38_v5  ;;  %882 = vmatpush.msra.mxu2 %v38_v5 }
   0x9   :  { %142 = vmatpush.msra.mxu1 %v1059_v8  ;;  %299 = vmatpush.msra.mxu3 %v1059_v8 }
   0xa   :  { %83 = vmatpush.msra.mxu0 %v37_v7  ;;  %143 = vmatmul.f32.vlgmr.msra.gmra.mxu1 %v971_v11 }
   0xb   :  { %883 = vmatpush.msra.mxu2 %v37_v7  ;;  %376 = vmatpush.msrb.mxu1 %v1035_v3 }
   0xc   :  { %84 = vmatpush.msra.mxu0 %v36_v9  ;;  %536 = vmatpush.msrb.mxu3 %v1035_v3 }
   0xd   :  { %884 = vmatpush.msra.mxu2 %v36_v9  ;;  %377 = vmatpush.msrb.mxu1 %v1040_v4 }
   0xe   :  { %85 = vmatpush.msra.mxu0 %v35_v10  ;;  %537 = vmatpush.msrb.mxu3 %v1040_v4 }
   0xf   :  { %885 = vmatpush.msra.mxu2 %v35_v10  ;;  %378 = vmatpush.msrb.mxu1 %v1049_v6 }
  0x10   :  { %86 = vmatpush.msra.mxu0 %v34_v12  ;;  %538 = vmatpush.msrb.mxu3 %v1049_v6 }
  0x11   :  { %848 = vmatmul.msk.f32.vlgmr.msra.gmra.mxu0 %vm46_vm0, %v26_v13  ;;  %886 = vmatpush.msra.mxu2 %v34_v12 }
  0x12   :  { %379 = vmatpush.msrb.mxu1 %v1059_v8  ;;  %539 = vmatpush.msrb.mxu3 %v1059_v8 }
  0x13   :  { %216 = vmatpush.msrb.mxu2 %v1035_v3 }
  0x14   :  { %616 = vmatpush.msra.mxu1 %v1035_v3  ;;  %854 = vmatmul.msk.f32.vlgmr.msra.gmra.mxu2 %vm46_vm0, %v32_v41 }
  0x15   :  { %217 = vmatpush.msrb.mxu2 %v1040_v4 }
  0x16   :  { %617 = vmatpush.msra.mxu1 %v1040_v4 }
  0x17   :  { %218 = vmatpush.msrb.mxu2 %v1049_v6 }
  0x18   :  { %618 = vmatpush.msra.mxu1 %v1049_v6 }
  0x19   :  { %219 = vmatpush.msrb.mxu2 %v1059_v8  ;;  %849 = vmatmul.msk.f32.gmra.mxu0 %vm46_vm0, %v27_v45 }
  0x1a   :  { %619 = vmatpush.msra.mxu1 %v1059_v8 }
  0x1b   :  { %456 = vmatpush.msra.mxu2 %v1035_v3 }
  0x1c   :  { %855 = vmatmul.msk.f32.gmra.mxu2 %vm46_vm0, %v33_v42 }
  0x1d   :  { %457 = vmatpush.msra.mxu2 %v1040_v4 }
  0x1f   :  { %458 = vmatpush.msra.mxu2 %v1049_v6 }
  0x21   :  { %459 = vmatpush.msra.mxu2 %v1059_v8 }
  0x87   :  { %v144_v16 = vpop.f32.mrf.mxu1 }
  0x8e   :  { %v88_v15 = vpop.f32.mrf.mxu0 }
  0x8f   :  { %v89_v17 = vadd.f32 %v1098_v14, %v88_v15 }
  0x91   :  { %v147_v18 = vadd.f32 %v144_v16, %v89_v17 }
  0x93   :  { %907 = vtanh.f32 %v147_v18  ;;  %v856_v20 = vmul.f32 -1.442695, %v147_v18 }
  0x95   :  { %909 = vpow2.f32 %v856_v20 }
  0x96   :  { %v91_v57 = vpop.f32.mrf.mxu0 }
  0x97   :  { %v1148_v55 = vpop.f32.mrf.mxu2  ;;  %v92_v58 = vadd.f32 %v1098_v14, %v91_v57 }
  0x99   :  { %v908_v19 = vpop.eup %907 }
  0x9a   :  { %170 = vrot.lane.b32.xlu0 %v908_v19, %s972_s27 }
  0x9b   :  { %v910_v21 = vpop.eup %909 }
  0x9c   :  { %v151_v22 = vadd.f32 1.0, %v910_v21  ;;  %v977_v21 = vmov 6  }
  0x9e   :  { %911 = vrcp.f32 %v151_v22  ;;  %v163_v28 = vand.u32 2147483648, %v151_v22  ;;  %vm157_vm2 = vweird.f32 %v151_v22  ;;  %v161_v29 = vand.u32 2147483647, %v151_v22 }
  0x9f   :  { %v1150_v56 = vpop.f32.mrf.mxu2 }
  0xa0   :  { %v164_v31 = vor.u32 1.1754944e-38, %v163_v28  ;;  %vm162_vm4 = vcmp.eq.f32.partialorder %v161_v29, 8.507059e+37 }
  0xa4   :  { %v912_v23 = vpop.eup %911 }
  0xa5   :  { %v153_v24 = vmul.f32 %v912_v23, %v151_v22  ;;  %vm158_vm1 = vweird.f32 %v912_v23  ;;  %v266_v22 = vsel %vm122_vm5, 1, %v977_v21 }
  0xa6   :  { %vm159_vm3 = vmor %vm157_vm2, %vm158_vm1 }
  0xa7   :  { %v154_v25 = vsub.f32 1.0, %v153_v24 }
  0xa9   :  { %v155_v26 = vmul.f32 %v912_v23, %v154_v25  ;;  %v28_v25 = vld [vmem:[%s1338_s0 + $0x10] sm:$0xff] }
  0xaa   :  { %850 = vmatmul.msk.f32.gmra.mxu0 %vm46_vm0, %v28_v25 }
  0xab   :  { %v156_v27 = vadd.f32 %v912_v23, %v155_v26 }
  0xad   :  { %v160_v30 = vsel %vm159_vm3, %v912_v23, %v156_v27 }
  0xae   :  { %v165_v33 = vsel %vm162_vm4, %v164_v31, %v160_v30 }
  0xaf   :  { %v168_v36 = vmul.f32 0.0, %v165_v33 }
 0x10c   :  { %v171_v32 = vpop.permute.xlu0 %170 }
 0x10d   :  { %v173_v34 = vmul.f32 %v171_v32, %v165_v33 }
 0x10f   :  { %175 = vrot.lane.b32.xlu0 %v173_v34, %s973_s3 }
 0x127   :  { %v94_v29 = vpop.f32.mrf.mxu0 }
 0x128   :  { %v95_v30 = vadd.f32 %v1098_v14, %v94_v29 }
 0x181   :  { %v176_v37 = vpop.permute.xlu0 %175 }
 0x182   :  { %v178_v38 = vadd.f32 %v176_v37, %v168_v36 }
 0x184   :  { %913 = vtanh.f32 %v178_v38 }
 0x18a   :  { %v914_v39 = vpop.eup %913 }
 0x18b   :  { %181 = vrot.lane.b32.xlu1 %v914_v39, %s972_s27 }
 0x193   :  { %118 = vperm.xlu1 %903, %v116_v40  }
 0x1fd   :  { %v182_v43 = vpop.permute.xlu1 %181 }
 0x1fe   :  { %v184_v44 = vmul.f32 %v182_v43, %v165_v33 }
 0x200   :  { %188 = vrot.lane.b32.xlu2 %v184_v44, %s973_s3 }
 0x205   :  { %v1130_v48 = vpop.permute.xlu1 %118 }
 0x206   :  { %vm186_vm6 = vcmp.lt.s32.totalorder %v185_v50, %v1130_v48  ;;  %vm267_vm14 = vcmp.lt.s32.totalorder %v266_v22, %v1130_v48 }
 0x208   :  { %193 = vrot.lane.b32.xlu2 %v178_v38, %s975_s1 }
 0x25a   :  { %v189_v51 = vpop.permute.xlu2 %188 }
 0x25b   :  { %v1135_v52 = vsel %vm186_vm6, %v189_v51, 0.0 }
 0x25c   :  { %198 = vst.msk [vmem:[#allocation2] sm:$0xff] %vm197_vm7, %v1135_v52  ;;  %857 = vmatmul.msk.f32.vlgmr.msrb.gmra.mxu2 %vm123_vm8, %v1135_v52 }
 0x25d   :  { %200 = vst.msk [vmem:[#allocation2 + $0x38] sm:$0xff] %vm199_vm9, %v1135_v52  ;;  %696 = vmatpush.msrb.mxu2 %v1035_v3 }
 0x25f   :  { %697 = vmatpush.msrb.mxu2 %v1040_v4 }
 0x261   :  { %698 = vmatpush.msrb.mxu2 %v1049_v6 }
 0x262   :  { %v194_v53 = vpop.permute.xlu2 %193 }
 0x263   :  { %v196_v54 = vsel %vm186_vm6, %v194_v53, 0.0  ;;  %699 = vmatpush.msrb.mxu2 %v1059_v8 }
 0x264   :  { %246 = vrot.lane.b32.xlu1 %v196_v54, %s973_s3 }
 0x2d6   :  { %v247_v13 = vpop.permute.xlu1 %246 }
 0x2df   :  { %v221_v59 = vpop.f32.mrf.mxu2 }
 0x2e0   :  { %v224_v60 = vadd.f32 %v221_v59, %v92_v58  ;;  %v29_v59 = vld [vmem:[%s1338_s0 + $0x18] sm:$0xff] }
 0x2e1   :  { %851 = vmatmul.msk.f32.gmra.mxu0 %vm46_vm0, %v29_v59 }
 0x2e2   :  { %915 = vtanh.f32 %v224_v60  ;;  %v858_v62 = vmul.f32 -1.442695, %v224_v60 }
 0x2e4   :  { %917 = vpow2.f32 %v858_v62  ;;  %v978_v62 = vmov 5  }
 0x2e8   :  { %v916_v61 = vpop.eup %915 }
 0x2e9   :  { %251 = vrot.lane.b32.xlu0 %v916_v61, %s972_s27 }
 0x2ea   :  { %v918_v63 = vpop.eup %917 }
 0x2eb   :  { %v228_v0 = vadd.f32 1.0, %v918_v63  ;;  %v346_v63 = vsel %vm122_vm5, 2, %v978_v62 }
 0x2ec   :  { %vm347_vm4 = vcmp.lt.s32.totalorder %v346_v63, %v1130_v48 }
 0x2ed   :  { %919 = vrcp.f32 %v228_v0  ;;  %v240_v6 = vand.u32 2147483648, %v228_v0  ;;  %vm234_vm11 = vweird.f32 %v228_v0  ;;  %v238_v7 = vand.u32 2147483647, %v228_v0 }
 0x2ef   :  { %v241_v9 = vor.u32 1.1754944e-38, %v240_v6  ;;  %vm239_vm13 = vcmp.eq.f32.partialorder %v238_v7, 8.507059e+37 }
 0x2f3   :  { %v920_v1 = vpop.eup %919 }
 0x2f4   :  { %v230_v2 = vmul.f32 %v920_v1, %v228_v0  ;;  %vm235_vm10 = vweird.f32 %v920_v1 }
 0x2f5   :  { %vm236_vm12 = vmor %vm234_vm11, %vm235_vm10 }
 0x2f6   :  { %v231_v3 = vsub.f32 1.0, %v230_v2 }
 0x2f8   :  { %v232_v4 = vmul.f32 %v920_v1, %v231_v3 }
 0x2fa   :  { %v233_v5 = vadd.f32 %v920_v1, %v232_v4 }
 0x2fc   :  { %v237_v8 = vsel %vm236_vm12, %v920_v1, %v233_v5 }
 0x2fd   :  { %v242_v11 = vsel %vm239_vm13, %v241_v9, %v237_v8 }
 0x2fe   :  { %v249_v15 = vmul.f32 %v247_v13, %v242_v11 }
 0x35b   :  { %v252_v10 = vpop.permute.xlu0 %251 }
 0x35c   :  { %v254_v12 = vmul.f32 %v252_v10, %v242_v11 }
 0x35e   :  { %256 = vrot.lane.b32.xlu2 %v254_v12, %s973_s3  ;;  %v97_v5 = vpop.f32.mrf.mxu0 }
 0x35f   :  { %v98_v6 = vadd.f32 %v1098_v14, %v97_v5 }
 0x3b8   :  { %v257_v16 = vpop.permute.xlu2 %256 }
 0x3b9   :  { %v259_v17 = vadd.f32 %v257_v16, %v249_v15 }
 0x3bb   :  { %921 = vtanh.f32 %v259_v17  ;;  %274 = vrot.lane.b32.xlu2 %v259_v17, %s975_s1 }
 0x3c1   :  { %v922_v18 = vpop.eup %921 }
 0x3c2   :  { %262 = vrot.lane.b32.xlu0 %v922_v18, %s972_s27 }
 0x415   :  { %v275_v23 = vpop.permute.xlu2 %274 }
 0x416   :  { %v277_v24 = vsel %vm267_vm14, %v275_v23, %v196_v54 }
 0x434   :  { %v263_v19 = vpop.permute.xlu0 %262 }
 0x435   :  { %v265_v20 = vmul.f32 %v263_v19, %v242_v11 }
 0x437   :  { %269 = vrot.lane.b32.xlu1 %v265_v20, %s973_s3 }
 0x43f   :  { %326 = vrot.lane.b32.xlu1 %v277_v24, %s973_s3 }
 0x4a9   :  { %v270_v26 = vpop.permute.xlu1 %269 }
 0x4aa   :  { %v278_v27 = vsel %vm267_vm14, %v270_v26, 0.0  ;;  %v272_v28 = vsel %vm267_vm14, %v270_v26, %v1135_v52 }
 0x4ab   :  { %279 = vst.msk [vmem:[#allocation2 + $0x8] sm:$0xff] %vm197_vm7, %v278_v27  ;;  %859 = vmatmul.msk.f32.vlgmr.msra.gmra.mxu3 %vm123_vm8, %v272_v28 }
 0x4ac   :  { %280 = vst.msk [vmem:[#allocation2 + $0x30] sm:$0xff] %vm199_vm9, %v278_v27 }
 0x4b1   :  { %v327_v52 = vpop.permute.xlu1 %326 }
 0x52e   :  { %v301_v31 = vpop.f32.mrf.mxu3 }
 0x52f   :  { %v304_v32 = vadd.f32 %v301_v31, %v95_v30 }
 0x531   :  { %923 = vtanh.f32 %v304_v32  ;;  %v860_v34 = vmul.f32 -1.442695, %v304_v32 }
 0x533   :  { %925 = vpow2.f32 %v860_v34 }
 0x537   :  { %v924_v33 = vpop.eup %923 }
 0x538   :  { %331 = vrot.lane.b32.xlu0 %v924_v33, %s972_s27  ;;  %v979_v33 = vmov 4  }
 0x539   :  { %v926_v36 = vpop.eup %925  ;;  %v426_v34 = vsel %vm122_vm5, 3, %v979_v33 }
 0x53a   :  { %v308_v37 = vadd.f32 1.0, %v926_v36  ;;  %vm427_vm13 = vcmp.lt.s32.totalorder %v426_v34, %v1130_v48 }
 0x53c   :  { %927 = vrcp.f32 %v308_v37  ;;  %v320_v43 = vand.u32 2147483648, %v308_v37  ;;  %vm314_vm1 = vweird.f32 %v308_v37  ;;  %v318_v44 = vand.u32 2147483647, %v308_v37 }
 0x53e   :  { %v321_v46 = vor.u32 1.1754944e-38, %v320_v43  ;;  %vm319_vm3 = vcmp.eq.f32.partialorder %v318_v44, 8.507059e+37 }
 0x542   :  { %v928_v38 = vpop.eup %927 }
 0x543   :  { %v310_v39 = vmul.f32 %v928_v38, %v308_v37  ;;  %vm315_vm15 = vweird.f32 %v928_v38 }
 0x544   :  { %vm316_vm2 = vmor %vm314_vm1, %vm315_vm15 }
 0x545   :  { %v311_v40 = vsub.f32 1.0, %v310_v39 }
 0x547   :  { %v312_v41 = vmul.f32 %v928_v38, %v311_v40 }
 0x549   :  { %v313_v42 = vadd.f32 %v928_v38, %v312_v41 }
 0x54b   :  { %v317_v45 = vsel %vm316_vm2, %v928_v38, %v313_v42  ;;  %v30_v38 = vld [vmem:[%s1338_s0 + $0x20] sm:$0xff] }
 0x54c   :  { %v322_v50 = vsel %vm319_vm3, %v321_v46, %v317_v45  ;;  %852 = vmatmul.msk.f32.gmra.mxu0 %vm46_vm0, %v30_v38 }
 0x54d   :  { %v329_v53 = vmul.f32 %v327_v52, %v322_v50 }
 0x5aa   :  { %v332_v49 = vpop.permute.xlu0 %331 }
 0x5ab   :  { %v334_v51 = vmul.f32 %v332_v49, %v322_v50 }
 0x5ad   :  { %336 = vrot.lane.b32.xlu2 %v334_v51, %s973_s3 }
 0x5c9   :  { %v100_v42 = vpop.f32.mrf.mxu0 }
 0x5ca   :  { %v101_v43 = vadd.f32 %v1098_v14, %v100_v42 }
 0x607   :  { %v337_v54 = vpop.permute.xlu2 %336 }
 0x608   :  { %v339_v57 = vadd.f32 %v337_v54, %v329_v53 }
 0x60a   :  { %929 = vtanh.f32 %v339_v57  ;;  %354 = vrot.lane.b32.xlu2 %v339_v57, %s975_s1 }
 0x610   :  { %v930_v58 = vpop.eup %929 }
 0x611   :  { %342 = vrot.lane.b32.xlu0 %v930_v58, %s972_s27 }
 0x664   :  { %v355_v0 = vpop.permute.xlu2 %354 }
 0x665   :  { %v357_v1 = vsel %vm347_vm4, %v355_v0, %v277_v24 }
 0x683   :  { %v343_v60 = vpop.permute.xlu0 %342 }
 0x684   :  { %v345_v61 = vmul.f32 %v343_v60, %v322_v50 }
 0x686   :  { %349 = vrot.lane.b32.xlu1 %v345_v61, %s973_s3 }
 0x68e   :  { %406 = vrot.lane.b32.xlu1 %v357_v1, %s973_s3 }
 0x6f8   :  { %v350_v2 = vpop.permute.xlu1 %349 }
 0x6f9   :  { %v352_v3 = vsel %vm347_vm4, %v350_v2, %v272_v28  ;;  %v358_v4 = vsel %vm347_vm4, %v350_v2, 0.0 }
 0x6fa   :  { %359 = vst.msk [vmem:[#allocation2 + $0x10] sm:$0xff] %vm197_vm7, %v358_v4  ;;  %861 = vmatmul.msk.f32.vlgmr.msrb.gmra.mxu1 %vm123_vm8, %v352_v3 }
 0x6fb   :  { %360 = vst.msk [vmem:[#allocation2 + $0x28] sm:$0xff] %vm199_vm9, %v358_v4 }
 0x700   :  { %v407_v26 = vpop.permute.xlu1 %406 }
 0x777   :  { %v381_v7 = vpop.f32.mrf.mxu1 }
 0x778   :  { %v384_v8 = vadd.f32 %v381_v7, %v98_v6 }
 0x77a   :  { %931 = vtanh.f32 %v384_v8  ;;  %v862_v10 = vmul.f32 -1.442695, %v384_v8 }
 0x77c   :  { %933 = vpow2.f32 %v862_v10 }
 0x780   :  { %v932_v9 = vpop.eup %931 }
 0x781   :  { %411 = vrot.lane.b32.xlu0 %v932_v9, %s972_s27  ;;  %v980_v9 = vmov 3  }
 0x782   :  { %v934_v11 = vpop.eup %933  ;;  %v506_v10 = vsel %vm122_vm5, 4, %v980_v9 }
 0x783   :  { %v388_v12 = vadd.f32 1.0, %v934_v11  ;;  %vm507_vm3 = vcmp.lt.s32.totalorder %v506_v10, %v1130_v48 }
 0x785   :  { %935 = vrcp.f32 %v388_v12  ;;  %v400_v19 = vand.u32 2147483648, %v388_v12  ;;  %vm394_vm10 = vweird.f32 %v388_v12  ;;  %v398_v20 = vand.u32 2147483647, %v388_v12 }
 0x787   :  { %v401_v22 = vor.u32 1.1754944e-38, %v400_v19  ;;  %vm399_vm12 = vcmp.eq.f32.partialorder %v398_v20, 8.507059e+37 }
 0x78b   :  { %v936_v13 = vpop.eup %935 }
 0x78c   :  { %v390_v15 = vmul.f32 %v936_v13, %v388_v12  ;;  %vm395_vm6 = vweird.f32 %v936_v13 }
 0x78d   :  { %vm396_vm11 = vmor %vm394_vm10, %vm395_vm6 }
 0x78e   :  { %v391_v16 = vsub.f32 1.0, %v390_v15  ;;  %v765_v15 = vld [vmem:[%s1340_s5 + $0x10] sm:$0xff] }
 0x790   :  { %v392_v17 = vmul.f32 %v936_v13, %v391_v16  ;;  %v31_v16 = vld [vmem:[%s1338_s0 + $0x28] sm:$0xff] }
 0x791   :  { %853 = vmatmul.msk.f32.gmra.mxu0 %vm46_vm0, %v31_v16 }
 0x792   :  { %v393_v18 = vadd.f32 %v936_v13, %v392_v17  ;;  %v764_v17 = vld [vmem:[%s1340_s5 + $0x8] sm:$0xff] }
 0x794   :  { %v397_v21 = vsel %vm396_vm11, %v936_v13, %v393_v18  ;;  %v766_v13 = vld [vmem:[%s1340_s5 + $0x18] sm:$0xff]  ;;  %v763_v18 = vld [vmem:[%s1340_s5] sm:$0xff] }
 0x795   :  { %v402_v24 = vsel %vm399_vm12, %v401_v22, %v397_v21  ;;  %887 = vmatpush.msra.mxu3 %v766_v13  ;;  %807 = vmatpush.msrb.mxu1 %v766_v13 }
 0x796   :  { %v409_v27 = vmul.f32 %v407_v26, %v402_v24 }
 0x797   :  { %888 = vmatpush.msra.mxu3 %v765_v15  ;;  %808 = vmatpush.msrb.mxu1 %v765_v15 }
 0x799   :  { %889 = vmatpush.msra.mxu3 %v764_v17  ;;  %809 = vmatpush.msrb.mxu1 %v764_v17 }
 0x79b   :  { %890 = vmatpush.msra.mxu3 %v763_v18  ;;  %810 = vmatpush.msrb.mxu1 %v763_v18 }
 0x7f3   :  { %v412_v23 = vpop.permute.xlu0 %411 }
 0x7f4   :  { %v414_v25 = vmul.f32 %v412_v23, %v402_v24 }
 0x7f6   :  { %416 = vrot.lane.b32.xlu2 %v414_v25, %s973_s3 }
 0x850   :  { %v417_v28 = vpop.permute.xlu2 %416 }
 0x851   :  { %v419_v29 = vadd.f32 %v417_v28, %v409_v27  ;;  %v1255_v28 = vld [vmem:[%s1341_s6] ss:$0 sm:$0xff] }
 0x853   :  { %937 = vtanh.f32 %v419_v29  ;;  %434 = vrot.lane.b32.xlu2 %v419_v29, %s975_s1 }
 0x859   :  { %v938_v30 = vpop.eup %937 }
 0x85a   :  { %422 = vrot.lane.b32.xlu0 %v938_v30, %s972_s27 }
 0x8ad   :  { %v435_v36 = vpop.permute.xlu2 %434 }
 0x8ae   :  { %v437_v37 = vsel %vm427_vm13, %v435_v36, %v357_v1 }
 0x8cc   :  { %v423_v31 = vpop.permute.xlu0 %422 }
 0x8cd   :  { %v425_v32 = vmul.f32 %v423_v31, %v402_v24  ;;  %v103_v24 = vpop.f32.mrf.mxu0 }
 0x8ce   :  { %v104_v25 = vadd.f32 %v1098_v14, %v103_v24 }
 0x8cf   :  { %429 = vrot.lane.b32.xlu1 %v425_v32, %s973_s3 }
 0x8d7   :  { %486 = vrot.lane.b32.xlu1 %v437_v37, %s973_s3 }
 0x941   :  { %v430_v39 = vpop.permute.xlu1 %429 }
 0x942   :  { %v1201_v40 = vsel %vm427_vm13, %v430_v39, %v352_v3  ;;  %v438_v41 = vsel %vm427_vm13, %v430_v39, 0.0 }
 0x943   :  { %439 = vst.msk [vmem:[#allocation2 + $0x18] sm:$0xff] %vm197_vm7, %v438_v41  ;;  %863 = vmatmul.msk.f32.vlgmr.msra.gmra.mxu2 %vm123_vm8, %v1201_v40 }
 0x944   :  { %440 = vst.msk [vmem:[#allocation2 + $0x20] sm:$0xff] %vm199_vm9, %v438_v41 }
 0x949   :  { %v487_v2 = vpop.permute.xlu1 %486 }
 0x9c6   :  { %v461_v44 = vpop.f32.mrf.mxu2 }
 0x9c7   :  { %v464_v45 = vadd.f32 %v461_v44, %v101_v43 }
 0x9c9   :  { %939 = vtanh.f32 %v464_v45  ;;  %v864_v49 = vmul.f32 -1.442695, %v464_v45 }
 0x9cb   :  { %941 = vpow2.f32 %v864_v49 }
 0x9cf   :  { %v940_v46 = vpop.eup %939 }
 0x9d0   :  { %491 = vrot.lane.b32.xlu0 %v940_v46, %s972_s27 }
 0x9d1   :  { %v942_v50 = vpop.eup %941 }
 0x9d2   :  { %v468_v51 = vadd.f32 1.0, %v942_v50 }
 0x9d4   :  { %943 = vrcp.f32 %v468_v51  ;;  %v480_v59 = vand.u32 2147483648, %v468_v51  ;;  %vm474_vm15 = vweird.f32 %v468_v51  ;;  %v478_v60 = vand.u32 2147483647, %v468_v51 }
 0x9d6   :  { %v481_v62 = vor.u32 1.1754944e-38, %v480_v59  ;;  %vm479_vm2 = vcmp.eq.f32.partialorder %v478_v60, 8.507059e+37 }
 0x9da   :  { %v944_v52 = vpop.eup %943 }
 0x9db   :  { %v470_v53 = vmul.f32 %v944_v52, %v468_v51  ;;  %vm475_vm14 = vweird.f32 %v944_v52 }
 0x9dc   :  { %vm476_vm1 = vmor %vm474_vm15, %vm475_vm14 }
 0x9dd   :  { %v471_v54 = vsub.f32 1.0, %v470_v53 }
 0x9df   :  { %v472_v57 = vmul.f32 %v944_v52, %v471_v54 }
 0x9e1   :  { %v473_v58 = vadd.f32 %v944_v52, %v472_v57 }
 0x9e3   :  { %v477_v61 = vsel %vm476_vm1, %v944_v52, %v473_v58 }
 0x9e4   :  { %v482_v0 = vsel %vm479_vm2, %v481_v62, %v477_v61  ;;  %v981_v61 = vmov 2  }
 0x9e5   :  { %v489_v3 = vmul.f32 %v487_v2, %v482_v0  ;;  %v586_v62 = vsel %vm122_vm5, 5, %v981_v61 }
 0x9e6   :  { %vm587_vm11 = vcmp.lt.s32.totalorder %v586_v62, %v1130_v48 }
 0xa42   :  { %v492_v63 = vpop.permute.xlu0 %491 }
 0xa43   :  { %v494_v1 = vmul.f32 %v492_v63, %v482_v0 }
 0xa45   :  { %496 = vrot.lane.b32.xlu2 %v494_v1, %s973_s3 }
 0xa9f   :  { %v497_v4 = vpop.permute.xlu2 %496 }
 0xaa0   :  { %v499_v5 = vadd.f32 %v497_v4, %v489_v3 }
 0xaa2   :  { %945 = vtanh.f32 %v499_v5  ;;  %514 = vrot.lane.b32.xlu2 %v499_v5, %s975_s1  ;;  %v107_v5 = vadd.f32 %v1098_v14, %v1148_v55 }
 0xaa8   :  { %v946_v6 = vpop.eup %945 }
 0xaa9   :  { %502 = vrot.lane.b32.xlu0 %v946_v6, %s972_s27 }
 0xafc   :  { %v515_v11 = vpop.permute.xlu2 %514 }
 0xafd   :  { %v1218_v12 = vsel %vm507_vm3, %v515_v11, %v437_v37 }
 0xb1b   :  { %v503_v7 = vpop.permute.xlu0 %502 }
 0xb1c   :  { %v505_v8 = vmul.f32 %v503_v7, %v482_v0 }
 0xb1e   :  { %509 = vrot.lane.b32.xlu1 %v505_v8, %s973_s3 }
 0xb26   :  { %566 = vrot.lane.b32.xlu1 %v1218_v12, %s973_s3 }
 0xb90   :  { %v510_v19 = vpop.permute.xlu1 %509 }
 0xb91   :  { %v1241_v20 = vsel %vm507_vm3, %v510_v19, %v1201_v40  ;;  %v518_v21 = vsel %vm507_vm3, %v510_v19, 0.0 }
 0xb92   :  { %519 = vst.msk [vmem:[#allocation2 + $0x20] sm:$0xff] %vm197_vm7, %v518_v21  ;;  %865 = vmatmul.msk.f32.vlgmr.msrb.gmra.mxu3 %vm123_vm8, %v1241_v20 }
 0xb93   :  { %520 = vst.msk [vmem:[#allocation2 + $0x18] sm:$0xff] %vm199_vm9, %v518_v21 }
 0xb98   :  { %v567_v52 = vpop.permute.xlu1 %566 }
 0xb99   :  { %v759_v23 = vld [vmem:[#allocation2 + $0x20] sm:$0xff] }
 0xb9a   :  { %v758_v22 = vld [vmem:[#allocation2 + $0x18] sm:$0xff] }
 0xb9b   :  { %874 = vmatmul.msk.f32.vlgmr.msra.gmra.mxu3 %vm123_vm8, %v758_v22 }
 0xba3   :  { %875 = vmatmul.msk.f32.gmra.mxu3 %vm123_vm8, %v759_v23 }
 0xc15   :  { %v541_v26 = vpop.f32.mrf.mxu3 }
 0xc16   :  { %v544_v27 = vadd.f32 %v541_v26, %v104_v25 }
 0xc18   :  { %947 = vtanh.f32 %v544_v27  ;;  %v866_v34 = vmul.f32 -1.442695, %v544_v27 }
 0xc1a   :  { %949 = vpow2.f32 %v866_v34  ;;  %v982_v34 = vmov 1  }
 0xc1e   :  { %v948_v29 = vpop.eup %947  ;;  %v821_v30 = vpop.f32.mrf.mxu3 }
 0xc1f   :  { %v822_v31 = vadd.f32 %v1255_v28, %v821_v30  ;;  %571 = vrot.lane.b32.xlu0 %v948_v29, %s972_s27 }
 0xc20   :  { %v950_v36 = vpop.eup %949 }
 0xc21   :  { %839 = vst [vmem:[%s1342_s7 + $0x18] sm:$0xff] %v822_v31  ;;  %v548_v37 = vadd.f32 1.0, %v950_v36  ;;  %v666_v36 = vsel %vm122_vm5, 6, %v982_v34 }
 0xc22   :  { %vm667_vm1 = vcmp.lt.s32.totalorder %v666_v36, %v1130_v48 }
 0xc23   :  { %951 = vrcp.f32 %v548_v37  ;;  %v560_v43 = vand.u32 2147483648, %v548_v37  ;;  %vm554_vm4 = vweird.f32 %v548_v37  ;;  %v558_v44 = vand.u32 2147483647, %v548_v37 }
 0xc25   :  { %v561_v46 = vor.u32 1.1754944e-38, %v560_v43  ;;  %vm559_vm10 = vcmp.eq.f32.partialorder %v558_v44, 8.507059e+37  ;;  %v110_v43 = vadd.f32 %v1098_v14, %v1150_v56 }
 0xc26   :  { %v824_v32 = vpop.f32.mrf.mxu3 }
 0xc27   :  { %v825_v33 = vadd.f32 %v1255_v28, %v824_v32 }
 0xc29   :  { %840 = vst [vmem:[%s1342_s7 + $0x20] sm:$0xff] %v825_v33  ;;  %v952_v38 = vpop.eup %951 }
 0xc2a   :  { %v550_v39 = vmul.f32 %v952_v38, %v548_v37  ;;  %vm555_vm0 = vweird.f32 %v952_v38 }
 0xc2b   :  { %vm556_vm6 = vmor %vm554_vm4, %vm555_vm0 }
 0xc2c   :  { %v551_v40 = vsub.f32 1.0, %v550_v39 }
 0xc2e   :  { %v552_v41 = vmul.f32 %v952_v38, %v551_v40 }
 0xc30   :  { %v553_v42 = vadd.f32 %v952_v38, %v552_v41 }
 0xc32   :  { %v557_v45 = vsel %vm556_vm6, %v952_v38, %v553_v42 }
 0xc33   :  { %v562_v50 = vsel %vm559_vm10, %v561_v46, %v557_v45 }
 0xc34   :  { %v569_v53 = vmul.f32 %v567_v52, %v562_v50 }
 0xc91   :  { %v572_v49 = vpop.permute.xlu0 %571 }
 0xc92   :  { %v574_v51 = vmul.f32 %v572_v49, %v562_v50 }
 0xc94   :  { %576 = vrot.lane.b32.xlu2 %v574_v51, %s973_s3 }
 0xcee   :  { %v577_v54 = vpop.permute.xlu2 %576 }
 0xcef   :  { %v579_v57 = vadd.f32 %v577_v54, %v569_v53 }
 0xcf1   :  { %953 = vtanh.f32 %v579_v57  ;;  %594 = vrot.lane.b32.xlu2 %v579_v57, %s975_s1 }
 0xcf7   :  { %v954_v58 = vpop.eup %953 }
 0xcf8   :  { %582 = vrot.lane.b32.xlu0 %v954_v58, %s972_s27 }
 0xd4b   :  { %v595_v63 = vpop.permute.xlu2 %594 }
 0xd4c   :  { %v597_v0 = vsel %vm587_vm11, %v595_v63, %v1218_v12 }
 0xd6a   :  { %v583_v59 = vpop.permute.xlu0 %582 }
 0xd6b   :  { %v585_v60 = vmul.f32 %v583_v59, %v562_v50 }
 0xd6d   :  { %589 = vrot.lane.b32.xlu1 %v585_v60, %s973_s3 }
 0xd75   :  { %646 = vrot.lane.b32.xlu1 %v597_v0, %s973_s3 }
 0xddf   :  { %v590_v1 = vpop.permute.xlu1 %589 }
 0xde0   :  { %v592_v2 = vsel %vm587_vm11, %v590_v1, %v1241_v20  ;;  %v598_v3 = vsel %vm587_vm11, %v590_v1, 0.0 }
 0xde1   :  { %599 = vst.msk [vmem:[#allocation2 + $0x28] sm:$0xff] %vm197_vm7, %v598_v3  ;;  %867 = vmatmul.msk.f32.vlgmr.msra.gmra.mxu1 %vm123_vm8, %v592_v2 }
 0xde2   :  { %600 = vst.msk [vmem:[#allocation2 + $0x10] sm:$0xff] %vm199_vm9, %v598_v3 }
 0xde7   :  { %v647_v26 = vpop.permute.xlu1 %646 }
 0xde8   :  { %v760_v4 = vld [vmem:[#allocation2 + $0x28] sm:$0xff] }
 0xde9   :  { %876 = vmatmul.msk.f32.gmra.mxu3 %vm123_vm8, %v760_v4 }
 0xe5e   :  { %v621_v6 = vpop.f32.mrf.mxu1 }
 0xe5f   :  { %v624_v7 = vadd.f32 %v621_v6, %v107_v5 }
 0xe61   :  { %955 = vtanh.f32 %v624_v7  ;;  %v868_v11 = vmul.f32 -1.442695, %v624_v7 }
 0xe63   :  { %957 = vpow2.f32 %v868_v11 }
 0xe67   :  { %v956_v8 = vpop.eup %955 }
 0xe68   :  { %651 = vrot.lane.b32.xlu0 %v956_v8, %s972_s27 }
 0xe69   :  { %v958_v12 = vpop.eup %957 }
 0xe6a   :  { %v628_v13 = vadd.f32 1.0, %v958_v12 }
 0xe6c   :  { %v827_v9 = vpop.f32.mrf.mxu3  ;;  %959 = vrcp.f32 %v628_v13  ;;  %v640_v19 = vand.u32 2147483648, %v628_v13  ;;  %vm634_vm13 = vweird.f32 %v628_v13  ;;  %v638_v20 = vand.u32 2147483647, %v628_v13 }
 0xe6d   :  { %v828_v10 = vadd.f32 %v1255_v28, %v827_v9  ;;  %v746_v9 = vsel %vm122_vm5, 7, %v974_v35 }
 0xe6e   :  { %v641_v22 = vor.u32 1.1754944e-38, %v640_v19  ;;  %vm639_vm15 = vcmp.eq.f32.partialorder %v638_v20, 8.507059e+37  ;;  %vm747_vm6 = vcmp.lt.s32.totalorder %v746_v9, %v1130_v48 }
 0xe6f   :  { %841 = vst [vmem:[%s1342_s7 + $0x28] sm:$0xff] %v828_v10 }
 0xe72   :  { %v960_v15 = vpop.eup %959 }
 0xe73   :  { %v630_v55 = vmul.f32 %v960_v15, %v628_v13  ;;  %vm635_vm12 = vweird.f32 %v960_v15 }
 0xe74   :  { %vm636_vm14 = vmor %vm634_vm13, %vm635_vm12 }
 0xe75   :  { %v631_v16 = vsub.f32 1.0, %v630_v55  ;;  %v757_v55 = vld [vmem:[#allocation2 + $0x10] sm:$0xff] }
 0xe77   :  { %v632_v17 = vmul.f32 %v960_v15, %v631_v16 }
 0xe79   :  { %v633_v18 = vadd.f32 %v960_v15, %v632_v17 }
 0xe7b   :  { %v637_v21 = vsel %vm636_vm14, %v960_v15, %v633_v18 }
 0xe7c   :  { %v642_v24 = vsel %vm639_vm15, %v641_v22, %v637_v21 }
 0xe7d   :  { %v649_v27 = vmul.f32 %v647_v26, %v642_v24 }
 0xeda   :  { %v652_v23 = vpop.permute.xlu0 %651 }
 0xedb   :  { %v654_v25 = vmul.f32 %v652_v23, %v642_v24 }
 0xedd   :  { %656 = vrot.lane.b32.xlu2 %v654_v25, %s973_s3 }
 0xf37   :  { %v657_v29 = vpop.permute.xlu2 %656 }
 0xf38   :  { %v659_v30 = vadd.f32 %v657_v29, %v649_v27 }
 0xf3a   :  { %961 = vtanh.f32 %v659_v30  ;;  %674 = vrot.lane.b32.xlu2 %v659_v30, %s975_s1 }
 0xf40   :  { %v962_v31 = vpop.eup %961 }
 0xf41   :  { %662 = vrot.lane.b32.xlu0 %v962_v31, %s972_s27 }
 0xf94   :  { %v675_v37 = vpop.permute.xlu2 %674 }
 0xf95   :  { %v677_v38 = vsel %vm667_vm1, %v675_v37, %v597_v0 }
 0xfb3   :  { %v663_v32 = vpop.permute.xlu0 %662 }
 0xfb4   :  { %v665_v33 = vmul.f32 %v663_v32, %v642_v24 }
 0xfb6   :  { %669 = vrot.lane.b32.xlu1 %v665_v33, %s973_s3 }
 0xfbe   :  { %726 = vrot.lane.b32.xlu1 %v677_v38, %s973_s3 }
0x1028   :  { %v670_v39 = vpop.permute.xlu1 %669 }
0x1029   :  { %v672_v40 = vsel %vm667_vm1, %v670_v39, %v592_v2  ;;  %v678_v41 = vsel %vm667_vm1, %v670_v39, 0.0 }
0x102a   :  { %679 = vst.msk [vmem:[#allocation2 + $0x30] sm:$0xff] %vm197_vm7, %v678_v41  ;;  %869 = vmatmul.msk.f32.vlgmr.msrb.gmra.mxu2 %vm123_vm8, %v672_v40 }
0x102b   :  { %680 = vst.msk [vmem:[#allocation2 + $0x8] sm:$0xff] %vm199_vm9, %v678_v41 }
0x1030   :  { %v727_v2 = vpop.permute.xlu1 %726 }
0x1031   :  { %v761_v42 = vld [vmem:[#allocation2 + $0x30] sm:$0xff] }
0x1032   :  { %877 = vmatmul.msk.f32.gmra.mxu3 %vm123_vm8, %v761_v42  ;;  %v756_v15 = vld [vmem:[#allocation2 + $0x8] sm:$0xff] }
0x10ad   :  { %v701_v44 = vpop.f32.mrf.mxu2 }
0x10ae   :  { %v704_v45 = vadd.f32 %v701_v44, %v110_v43 }
0x10b0   :  { %963 = vtanh.f32 %v704_v45  ;;  %v870_v51 = vmul.f32 -1.442695, %v704_v45 }
0x10b2   :  { %965 = vpow2.f32 %v870_v51 }
0x10b5   :  { %v830_v46 = vpop.f32.mrf.mxu3 }
0x10b6   :  { %v964_v49 = vpop.eup %963  ;;  %v831_v50 = vadd.f32 %v1255_v28, %v830_v46 }
0x10b7   :  { %731 = vrot.lane.b32.xlu0 %v964_v49, %s972_s27 }
0x10b8   :  { %842 = vst [vmem:[%s1342_s7 + $0x30] sm:$0xff] %v831_v50  ;;  %v966_v52 = vpop.eup %965 }
0x10b9   :  { %v708_v53 = vadd.f32 1.0, %v966_v52 }
0x10bb   :  { %967 = vrcp.f32 %v708_v53  ;;  %v720_v59 = vand.u32 2147483648, %v708_v53  ;;  %vm714_vm3 = vweird.f32 %v708_v53  ;;  %v718_v60 = vand.u32 2147483647, %v708_v53 }
0x10bd   :  { %v721_v62 = vor.u32 1.1754944e-38, %v720_v59  ;;  %vm719_vm4 = vcmp.eq.f32.partialorder %v718_v60, 8.507059e+37 }
0x10c1   :  { %v968_v54 = vpop.eup %967 }
0x10c2   :  { %v710_v14 = vmul.f32 %v968_v54, %v708_v53  ;;  %vm715_vm2 = vweird.f32 %v968_v54 }
0x10c3   :  { %vm716_vm0 = vmor %vm714_vm3, %vm715_vm2 }
0x10c4   :  { %v711_v56 = vsub.f32 1.0, %v710_v14 }
0x10c6   :  { %v712_v57 = vmul.f32 %v968_v54, %v711_v56 }
0x10c8   :  { %v713_v58 = vadd.f32 %v968_v54, %v712_v57 }
0x10ca   :  { %v717_v61 = vsel %vm716_vm0, %v968_v54, %v713_v58 }
0x10cb   :  { %v722_v0 = vsel %vm719_vm4, %v721_v62, %v717_v61 }
0x10cc   :  { %v729_v3 = vmul.f32 %v727_v2, %v722_v0 }
0x1129   :  { %v732_v63 = vpop.permute.xlu0 %731 }
0x112a   :  { %v734_v1 = vmul.f32 %v732_v63, %v722_v0 }
0x112c   :  { %736 = vrot.lane.b32.xlu2 %v734_v1, %s973_s3 }
0x1186   :  { %v737_v4 = vpop.permute.xlu2 %736 }
0x1187   :  { %v739_v5 = vadd.f32 %v737_v4, %v729_v3 }
0x1189   :  { %969 = vtanh.f32 %v739_v5 }
0x118f   :  { %v970_v6 = vpop.eup %969 }
0x1190   :  { %742 = vrot.lane.b32.xlu0 %v970_v6, %s972_s27 }
0x1202   :  { %v743_v7 = vpop.permute.xlu0 %742 }
0x1203   :  { %v745_v8 = vmul.f32 %v743_v7, %v722_v0 }
0x1205   :  { %749 = vrot.lane.b32.xlu1 %v745_v8, %s973_s3 }
0x1277   :  { %v750_v10 = vpop.permute.xlu1 %749 }
0x1278   :  { %v752_v11 = vsel %vm747_vm6, %v750_v10, 0.0 }
0x1279   :  { %753 = vst.msk [vmem:[#allocation2 + $0x38] sm:$0xff] %vm197_vm7, %v752_v11 }
0x127a   :  { %754 = vst.msk [vmem:[#allocation2] sm:$0xff] %vm199_vm9, %v752_v11 }
0x1280   :  { %v762_v12 = vld [vmem:[#allocation2 + $0x38] sm:$0xff] }
0x1281   :  { %v755_v13 = vld [vmem:[#allocation2] sm:$0xff]  ;;  %878 = vmatmul.msk.f32.gmra.mxu3 %vm123_vm8, %v762_v12 }
0x1282   :  { %871 = vmatmul.msk.f32.vlgmr.msrb.gmra.mxu1 %vm123_vm8, %v755_v13 }
0x128a   :  { %872 = vmatmul.msk.f32.gmra.mxu1 %vm123_vm8, %v756_v15 }
0x1292   :  { %873 = vmatmul.msk.f32.gmra.mxu1 %vm123_vm8, %v757_v55 }
0x12ff   :  { %v812_v35 = vpop.f32.mrf.mxu1 }
0x1300   :  { %v813_v47 = vadd.f32 %v1255_v28, %v812_v35 }
0x1302   :  { %836 = vst [vmem:[%s1342_s7] sm:$0xff] %v813_v47 }
0x1304   :  { %v833_v48 = vpop.f32.mrf.mxu3 }
0x1305   :  { %v834_v16 = vadd.f32 %v1255_v28, %v833_v48 }
0x1307   :  { %843 = vst [vmem:[%s1342_s7 + $0x38] sm:$0xff] %v834_v16  ;;  %v815_v17 = vpop.f32.mrf.mxu1 }
0x1308   :  { %v816_v18 = vadd.f32 %v1255_v28, %v815_v17 }
0x130a   :  { %837 = vst [vmem:[%s1342_s7 + $0x8] sm:$0xff] %v816_v18 }
0x130f   :  { %v818_v19 = vpop.f32.mrf.mxu1 }
0x1310   :  { %v819_v20 = vadd.f32 %v1255_v28, %v818_v19 }
0x1312   :  { %838 = vst [vmem:[%s1342_s7 + $0x10] sm:$0xff] %v819_v20 }

</bundles_post_ra>
